<compile_context>
chip_gen: v7x
topology: tpu7x:2x2x1
jax: 0.10.0
libtpu: 0.0.40
codegen_flags: <defaults>
</compile_context>

<pallas_src>
import functools

import jax
import jax.numpy as jnp
from jax.experimental import pallas as pl
from jax.experimental.pallas import tpu as pltpu


def _round_up(n, m):
    return ((n + m - 1) // m) * m


# ----------------------------------------------------------------------------
# Kernel
# ----------------------------------------------------------------------------
def vae_kernel(
    x_ref, eps_ref,
    w_enc_ref, b_enc_ref,          # encoder.linear : image -> hidden_p   (bf16 / f32 bias)
    w_mulv_ref, b_mulv_ref,        # encoder.mu || encoder.log_var : hidden_p -> 2*z_p (f32)
    w_dec_ref, b_dec_ref,          # decoder.linear : z_p -> hidden_p     (bf16 / f32 bias)
    w_rec_ref, b_rec_ref,          # decoder.recon  : hidden_p -> image   (bf16 / f32 bias)
    out_ref, mulv_ref,
):
    f32 = jnp.float32
    bf16 = jnp.bfloat16

    x = x_ref[...]                                                    # bf16 (block_b, image)

    # ---- Encoder ----
    h = jnp.dot(x, w_enc_ref[...], preferred_element_type=f32) + b_enc_ref[...]
    h = jnp.maximum(h, 0.0)                                           # ReLU, stays f32

    # Fused mu || log_var projection, kept in f32 (tiny matmul; keeps the
    # KL-relevant log_var out of the bf16 quantization path).
    mu_lv = jnp.dot(h, w_mulv_ref[...], preferred_element_type=f32) + b_mulv_ref[...]
    z_p = mu_lv.shape[1] // 2
    mu = mu_lv[:, :z_p]
    lv = mu_lv[:, z_p:]

    # ---- Reparameterize: z = mu + eps * exp(log_var / 2)  (f32) ----
    z = mu + eps_ref[...] * jnp.exp(lv * 0.5)

    # ---- Decoder ----
    hd = jnp.dot(z.astype(bf16), w_dec_ref[...], preferred_element_type=f32) + b_dec_ref[...]
    hd = jnp.maximum(hd, 0.0).astype(bf16)                            # ReLU
    logits = jnp.dot(hd, w_rec_ref[...], preferred_element_type=f32) + b_rec_ref[...]
    out = 0.5 * (jnp.tanh(logits * 0.5) + 1.0)                        # sigmoid via EUP tanh

    out_ref[...] = out.astype(out_ref.dtype)                          # bf16 recon
    mulv_ref[...] = mu_lv.astype(mulv_ref.dtype)                      # f32 lane-dense mu||lv


# ----------------------------------------------------------------------------
# Parameter preparation (done ONCE, outside the per-call path)
# ----------------------------------------------------------------------------
def prepare_params(params, hidden_p, z_p):
    """Pad hidden/z dims, fuse mu||log_var, cast matmul weights to bf16.

    Image dim is left unpadded (784 is sublane-aligned; full-dim blocks)."""
    image_size, hidden = params["w_enc"].shape
    z_dim = params["w_mu"].shape[1]

    def padw(w, r, c):
        return jnp.zeros((r, c), jnp.float32).at[: w.shape[0], : w.shape[1]].set(w)

    def padb(b, c):
        return jnp.zeros((1, c), jnp.float32).at[:, : b.shape[1]].set(b)

    w_mulv = jnp.zeros((hidden_p, 2 * z_p), jnp.float32)
    w_mulv = w_mulv.at[:hidden, :z_dim].set(params["w_mu"])
    w_mulv = w_mulv.at[:hidden, z_p: z_p + z_dim].set(params["w_lv"])
    b_mulv = jnp.zeros((1, 2 * z_p), jnp.float32)
    b_mulv = b_mulv.at[:, :z_dim].set(params["b_mu"])
    b_mulv = b_mulv.at[:, z_p: z_p + z_dim].set(params["b_lv"])

    return dict(
        w_enc=padw(params["w_enc"], image_size, hidden_p).astype(jnp.bfloat16),
        b_enc=padb(params["b_enc"], hidden_p),
        w_mulv=w_mulv,                                # f32 (precision of mu/log_var)
        b_mulv=b_mulv,
        w_dec=padw(params["w_dec"], z_p, hidden_p).astype(jnp.bfloat16),
        b_dec=padb(params["b_dec"], hidden_p),
        w_rec=padw(params["w_rec"], hidden_p, image_size).astype(jnp.bfloat16),
        b_rec=padb(params["b_rec"], image_size),
    )


def _default_block_b(B):
    if B >= 1024:
        return 256          # v6e may prefer 512 for very large B (pass block_b=512)
    if B > 256:
        return 128          # grid >= 2 steps per v7x TensorCore
    if B > 8:
        # Small batch: split into two grid steps so both v7x cores get work.
        return max(8, _round_up(-(-B // 2), 8))
    return 8


# ----------------------------------------------------------------------------
# Forward implementation (jitted, params passed as prepared pytree)
# ----------------------------------------------------------------------------
def _vae_forward_impl(x, eps, pp, *, z_dim, z_p, block_b):
    B, image_size = x.shape
    hidden_p = pp["w_enc"].shape[1]

    n_blocks = pl.cdiv(B, block_b)
    b_pad = n_blocks * block_b

    # Batch-tail + z padding only (image dim untouched); zero pads are exact no-ops.
    x_bf = x.astype(jnp.bfloat16)
    if b_pad != B:
        x_bf = jnp.pad(x_bf, ((0, b_pad - B), (0, 0)))
    eps_p = jnp.pad(eps, ((0, b_pad - B), (0, z_p - z_dim)))

    def batch_spec(cols):
        return pl.BlockSpec((block_b, cols), lambda i: (i, 0))

    # Constant-index weight specs stay VMEM-resident across the batch grid.
    # At block_b >= 512 single-buffer them to save scoped VMEM (v5e headroom).
    weight_kwargs = {} if block_b < 512 else {"pipeline_mode": pl.Buffered(1)}

    def full_spec(shape):
        return pl.BlockSpec(shape, lambda i: (0, 0), **weight_kwargs)

    in_specs = [
        batch_spec(image_size),                 # x        (block_b, 784)
        batch_spec(z_p),                        # eps      (block_b, z_p)
        full_spec((image_size, hidden_p)),      # w_enc
        full_spec((1, hidden_p)),               # b_enc
        full_spec((hidden_p, 2 * z_p)),         # w_mulv (f32)
        full_spec((1, 2 * z_p)),                # b_mulv
        full_spec((z_p, hidden_p)),             # w_dec
        full_spec((1, hidden_p)),               # b_dec
        full_spec((hidden_p, image_size)),      # w_rec
        full_spec((1, image_size)),             # b_rec
    ]
    out_specs = [
        batch_spec(image_size),                 # reconstructed image (bf16)
        batch_spec(2 * z_p),                    # mu || log_var (f32, lane-dense)
    ]
    out_shape = [
        jax.ShapeDtypeStruct((b_pad, image_size), jnp.bfloat16),
        jax.ShapeDtypeStruct((b_pad, 2 * z_p), jnp.float32),
    ]

    flops = 2 * b_pad * (image_size * hidden_p + hidden_p * 2 * z_p
                         + z_p * hidden_p + hidden_p * image_size)
    transcendentals = b_pad * (z_p + image_size)
    weight_bytes = (2 * (image_size * hidden_p + z_p * hidden_p + hidden_p * image_size)
                    + 4 * hidden_p * 2 * z_p)
    bias_bytes = 4 * (2 * hidden_p + 2 * z_p + image_size)
    io_bytes = b_pad * (2 * image_size + 4 * z_p + 2 * image_size + 4 * 2 * z_p)
    cost = pl.CostEstimate(flops=flops, transcendentals=transcendentals,
                           bytes_accessed=weight_bytes + bias_bytes + io_bytes)

    cp_kwargs = dict(dimension_semantics=("parallel",))
    if block_b >= 512:
        cp_kwargs["vmem_limit_bytes"] = 48 * 1024 * 1024

    out_pad, mulv_pad = pl.pallas_call(
        vae_kernel,
        out_shape=out_shape,
        grid_spec=pltpu.PrefetchScalarGridSpec(
            num_scalar_prefetch=0,
            grid=(n_blocks,),
            in_specs=in_specs,
            out_specs=out_specs,
        ),
        compiler_params=pltpu.CompilerParams(**cp_kwargs),
        cost_estimate=cost,
    )(
        x_bf, eps_p,
        pp["w_enc"], pp["b_enc"],
        pp["w_mulv"], pp["b_mulv"],
        pp["w_dec"], pp["b_dec"],
        pp["w_rec"], pp["b_rec"],
    )

    out_img = out_pad[:B] if b_pad != B else out_pad      # bf16 (B, image_size)
    mu = mulv_pad[:B, :z_dim]
    log_var = mulv_pad[:B, z_p: z_p + z_dim]
    return out_img, mu, log_var


def make_vae_forward(params, *, block_b=None):
    """Pad/cast the weights ONCE and return a jitted forward(x, eps)."""
    hidden = params["w_enc"].shape[1]
    z_dim = params["w_mu"].shape[1]
    hidden_p = _round_up(hidden, 128)
    z_p = _round_up(z_dim, 64)               # 2*z_p is a multiple of 128 lanes

    pp = jax.tree_util.tree_map(jnp.asarray, prepare_params(params, hidden_p, z_p))

    @functools.partial(jax.jit, static_argnames=("blk",))
    def fwd_jit(x, eps, pp, blk):
        return _vae_forward_impl(x, eps, pp, z_dim=z_dim, z_p=z_p, block_b=blk)

    def forward(x, eps):
        blk = block_b if block_b is not None else _default_block_b(x.shape[0])
        return fwd_jit(x, eps, pp, blk=blk)

    return forward


# ----------------------------------------------------------------------------
# Synthetic parameters + references
# ----------------------------------------------------------------------------
def init_params(key, image_size, hidden_dim, z_dim):
    """Deterministic synthetic parameters (Linear weights stored as (in, out))."""
    keys = jax.random.split(key, 10)

    def lin(kw, kb, fan_in, fan_out):
        bound = 1.0 / jnp.sqrt(jnp.float32(fan_in))
        w = jax.random.uniform(kw, (fan_in, fan_out), jnp.float32, -bound, bound)
        b = jax.random.uniform(kb, (1, fan_out), jnp.float32, -bound, bound)
        return w, b

    w_enc, b_enc = lin(keys[0], keys[1], image_size, hidden_dim)
    w_mu, b_mu = lin(keys[2], keys[3], hidden_dim, z_dim)
    w_lv, b_lv = lin(keys[4], keys[5], hidden_dim, z_dim)
    w_dec, b_dec = lin(keys[6], keys[7], z_dim, hidden_dim)
    w_rec, b_rec = lin(keys[8], keys[9], hidden_dim, image_size)
    return dict(
        w_enc=w_enc, b_enc=b_enc,
        w_mu=w_mu, b_mu=b_mu,
        w_lv=w_lv, b_lv=b_lv,
        w_dec=w_dec, b_dec=b_dec,
        w_rec=w_rec, b_rec=b_rec,
    )


def vae_ref(x, eps, p):
    """Pure-f32 JAX reference of the original module math."""
    h = jax.nn.relu(x @ p["w_enc"] + p["b_enc"])
    mu = h @ p["w_mu"] + p["b_mu"]
    lv = h @ p["w_lv"] + p["b_lv"]
    z = mu + eps * jnp.exp(lv * 0.5)
    hd = jax.nn.relu(z @ p["w_dec"] + p["b_dec"])
    out = jax.nn.sigmoid(hd @ p["w_rec"] + p["b_rec"])
    return out, mu, lv


def vae_ref_matched(x, eps, p):
    """Reference mirroring the kernel's mixed bf16/f32 precision path."""
    f32, bf = jnp.float32, jnp.bfloat16
    h = jnp.dot(x.astype(bf), p["w_enc"].astype(bf), preferred_element_type=f32) + p["b_enc"]
    h = jnp.maximum(h, 0.0)                                   # f32, as in the kernel
    mu = jnp.dot(h, p["w_mu"], preferred_element_type=f32) + p["b_mu"]
    lv = jnp.dot(h, p["w_lv"], preferred_element_type=f32) + p["b_lv"]
    z = mu + eps * jnp.exp(lv * 0.5)
    hd = jnp.dot(z.astype(bf), p["w_dec"].astype(bf), preferred_element_type=f32) + p["b_dec"]
    hd = jnp.maximum(hd, 0.0).astype(bf)
    logits = jnp.dot(hd, p["w_rec"].astype(bf), preferred_element_type=f32) + p["b_rec"]
    out = 0.5 * (jnp.tanh(logits * 0.5) + 1.0)
    return out, mu, lv


# ----------------------------------------------------------------------------
# Demo / self-test
# ----------------------------------------------------------------------------
if __name__ == "__main__":
    # Module-default feature dims (image_size=784, hidden=400, z=20); small
    # batch, chosen so the default block_b heuristic gives a 2-step "parallel"
    # grid (both v7x TensorCores get work and the DMAs pipeline).
    B, IMAGE_SIZE, HIDDEN_DIM, Z_DIM = 16, 784, 400, 20

    key = jax.random.PRNGKey(0)
    k_params, k_x, k_eps = jax.random.split(key, 3)

    params = init_params(k_params, IMAGE_SIZE, HIDDEN_DIM, Z_DIM)
    x = jax.random.uniform(k_x, (B, IMAGE_SIZE), jnp.float32)       # image-like input in [0,1)
    # epsilon ~ N(0,1) generated outside the kernel (deterministic stand-in for torch.randn)
    eps = jax.random.normal(k_eps, (B, Z_DIM), jnp.float32)

    forward = make_vae_forward(params)          # weights padded/cast once, wrapper jitted
    out_img, mu, log_var = forward(x, eps)
    jax.block_until_ready((out_img, mu, log_var))

    assert out_img.shape == (B, IMAGE_SIZE) and out_img.dtype == jnp.bfloat16
    assert mu.shape == (B, Z_DIM) and log_var.shape == (B, Z_DIM)

    # Precision-matched reference (same bf16/f32 path as the kernel).
    m_out, m_mu, m_lv = vae_ref_matched(x, eps, params)
    assert jnp.allclose(out_img.astype(jnp.float32), m_out, atol=1.5e-2, rtol=1e-2)
    assert jnp.allclose(mu, m_mu, atol=1e-2, rtol=1e-2)
    assert jnp.allclose(log_var, m_lv, atol=1e-2, rtol=1e-2)

    # Loose sanity check against the pure-f32 reference (bf16 quantization of
    # x / encoder / decoder weights; mu & log_var stay on the f32 path).
    r_out, r_mu, r_lv = vae_ref(x, eps, params)
    assert jnp.allclose(out_img.astype(jnp.float32), r_out, atol=5e-2)
    assert jnp.allclose(mu, r_mu, atol=5e-2)
    assert jnp.allclose(log_var, r_lv, atol=5e-2)

    print("KERNEL_OK")
</pallas_src>

<mosaic_0001>
module attributes {stable_mosaic.version = 11 : i64} {
  func.func @vae_kernel(%arg0: i32, %arg1: memref<8x784xbf16, #tpu.memory_space<vmem>>, %arg2: memref<8x64xf32, #tpu.memory_space<vmem>>, %arg3: memref<784x512xbf16, #tpu.memory_space<vmem>>, %arg4: memref<1x512xf32, #tpu.memory_space<vmem>>, %arg5: memref<512x128xf32, #tpu.memory_space<vmem>>, %arg6: memref<1x128xf32, #tpu.memory_space<vmem>>, %arg7: memref<64x512xbf16, #tpu.memory_space<vmem>>, %arg8: memref<1x512xf32, #tpu.memory_space<vmem>>, %arg9: memref<512x784xbf16, #tpu.memory_space<vmem>>, %arg10: memref<1x784xf32, #tpu.memory_space<vmem>>, %arg11: memref<8x784xbf16, #tpu.memory_space<vmem>>, %arg12: memref<8x128xf32, #tpu.memory_space<vmem>>) attributes {dimension_semantics = [#tpu.dimension_semantics<parallel>], iteration_bounds = array<i64: 2>, scalar_prefetch = 0 : i64, scratch_operands = 0 : i64, tpu.core_type = #tpu.core_type<tc>, window_params = [{transform_indices = @transform_0, window_bounds = array<i64: 8, 784>}, {transform_indices = @transform_1, window_bounds = array<i64: 8, 64>}, {pipeline_mode = #tpu.pipeline_mode<synchronous>, transform_indices = @transform_2, window_bounds = array<i64: 784, 512>}, {pipeline_mode = #tpu.pipeline_mode<synchronous>, transform_indices = @transform_3, window_bounds = array<i64: 1, 512>}, {pipeline_mode = #tpu.pipeline_mode<synchronous>, transform_indices = @transform_4, window_bounds = array<i64: 512, 128>}, {pipeline_mode = #tpu.pipeline_mode<synchronous>, transform_indices = @transform_5, window_bounds = array<i64: 1, 128>}, {pipeline_mode = #tpu.pipeline_mode<synchronous>, transform_indices = @transform_6, window_bounds = array<i64: 64, 512>}, {pipeline_mode = #tpu.pipeline_mode<synchronous>, transform_indices = @transform_7, window_bounds = array<i64: 1, 512>}, {pipeline_mode = #tpu.pipeline_mode<synchronous>, transform_indices = @transform_8, window_bounds = array<i64: 512, 784>}, {pipeline_mode = #tpu.pipeline_mode<synchronous>, transform_indices = @transform_9, window_bounds = array<i64: 1, 784>}, {transform_indices = @transform_10, window_bounds = array<i64: 8, 784>}, {transform_indices = @transform_11, window_bounds = array<i64: 8, 128>}]} {
    %c0 = arith.constant 0 : index
    %c0_0 = arith.constant 0 : index
    %0 = vector.load %arg1[%c0, %c0_0] : memref<8x784xbf16, #tpu.memory_space<vmem>>, vector<8x784xbf16>
    %c0_1 = arith.constant 0 : index
    %c0_2 = arith.constant 0 : index
    %1 = vector.load %arg3[%c0_1, %c0_2] : memref<784x512xbf16, #tpu.memory_space<vmem>>, vector<784x512xbf16>
    %cst = arith.constant dense<0.000000e+00> : vector<8x512xf32>
    %2 = tpu.matmul %0, %1, %cst {dimension_numbers = #tpu.dot_dimension_numbers<[1], [0], [0], [1], [0, 0, 1, 1], [], []>} : vector<8x784xbf16>, vector<784x512xbf16>, vector<8x512xf32> -> vector<8x512xf32>
    %c0_3 = arith.constant 0 : index
    %c0_4 = arith.constant 0 : index
    %3 = vector.load %arg4[%c0_3, %c0_4] : memref<1x512xf32, #tpu.memory_space<vmem>>, vector<1x512xf32>
    %4 = vector.broadcast %3 : vector<1x512xf32> to vector<8x512xf32>
    %5 = arith.addf %2, %4 : vector<8x512xf32>
    %cst_5 = arith.constant 0.000000e+00 : f32
    %6 = vector.broadcast %cst_5 : f32 to vector<8x512xf32>
    %7 = arith.maximumf %5, %6 : vector<8x512xf32>
    %c0_6 = arith.constant 0 : index
    %c0_7 = arith.constant 0 : index
    %8 = vector.load %arg5[%c0_6, %c0_7] : memref<512x128xf32, #tpu.memory_space<vmem>>, vector<512x128xf32>
    %cst_8 = arith.constant dense<0.000000e+00> : vector<8x128xf32>
    %9 = tpu.matmul %7, %8, %cst_8 {dimension_numbers = #tpu.dot_dimension_numbers<[1], [0], [0], [1], [0, 0, 1, 1], [], []>} : vector<8x512xf32>, vector<512x128xf32>, vector<8x128xf32> -> vector<8x128xf32>
    %c0_9 = arith.constant 0 : index
    %c0_10 = arith.constant 0 : index
    %10 = vector.load %arg6[%c0_9, %c0_10] : memref<1x128xf32, #tpu.memory_space<vmem>>, vector<1x128xf32>
    %11 = vector.broadcast %10 : vector<1x128xf32> to vector<8x128xf32>
    %12 = arith.addf %9, %11 : vector<8x128xf32>
    %13 = vector.extract_strided_slice %12 {offsets = [0, 0], sizes = [8, 64], strides = [1, 1]} : vector<8x128xf32> to vector<8x64xf32>
    %14 = vector.extract_strided_slice %12 {offsets = [0, 64], sizes = [8, 64], strides = [1, 1]} : vector<8x128xf32> to vector<8x64xf32>
    %c0_11 = arith.constant 0 : index
    %c0_12 = arith.constant 0 : index
    %15 = vector.load %arg2[%c0_11, %c0_12] : memref<8x64xf32, #tpu.memory_space<vmem>>, vector<8x64xf32>
    %cst_13 = arith.constant 5.000000e-01 : f32
    %16 = vector.broadcast %cst_13 : f32 to vector<8x64xf32>
    %17 = arith.mulf %14, %16 : vector<8x64xf32>
    %18 = math.exp %17 : vector<8x64xf32>
    %19 = arith.mulf %15, %18 : vector<8x64xf32>
    %20 = arith.addf %13, %19 : vector<8x64xf32>
    %21 = arith.truncf %20 : vector<8x64xf32> to vector<8x64xbf16>
    %c0_14 = arith.constant 0 : index
    %c0_15 = arith.constant 0 : index
    %22 = vector.load %arg7[%c0_14, %c0_15] : memref<64x512xbf16, #tpu.memory_space<vmem>>, vector<64x512xbf16>
    %cst_16 = arith.constant dense<0.000000e+00> : vector<8x512xf32>
    %23 = tpu.matmul %21, %22, %cst_16 {dimension_numbers = #tpu.dot_dimension_numbers<[1], [0], [0], [1], [0, 0, 1, 1], [], []>} : vector<8x64xbf16>, vector<64x512xbf16>, vector<8x512xf32> -> vector<8x512xf32>
    %c0_17 = arith.constant 0 : index
    %c0_18 = arith.constant 0 : index
    %24 = vector.load %arg8[%c0_17, %c0_18] : memref<1x512xf32, #tpu.memory_space<vmem>>, vector<1x512xf32>
    %25 = vector.broadcast %24 : vector<1x512xf32> to vector<8x512xf32>
    %26 = arith.addf %23, %25 : vector<8x512xf32>
    %cst_19 = arith.constant 0.000000e+00 : f32
    %27 = vector.broadcast %cst_19 : f32 to vector<8x512xf32>
    %28 = arith.maximumf %26, %27 : vector<8x512xf32>
    %29 = arith.truncf %28 : vector<8x512xf32> to vector<8x512xbf16>
    %c0_20 = arith.constant 0 : index
    %c0_21 = arith.constant 0 : index
    %30 = vector.load %arg9[%c0_20, %c0_21] : memref<512x784xbf16, #tpu.memory_space<vmem>>, vector<512x784xbf16>
    %cst_22 = arith.constant dense<0.000000e+00> : vector<8x784xf32>
    %31 = tpu.matmul %29, %30, %cst_22 {dimension_numbers = #tpu.dot_dimension_numbers<[1], [0], [0], [1], [0, 0, 1, 1], [], []>} : vector<8x512xbf16>, vector<512x784xbf16>, vector<8x784xf32> -> vector<8x784xf32>
    %c0_23 = arith.constant 0 : index
    %c0_24 = arith.constant 0 : index
    %32 = vector.load %arg10[%c0_23, %c0_24] : memref<1x784xf32, #tpu.memory_space<vmem>>, vector<1x784xf32>
    %33 = vector.broadcast %32 : vector<1x784xf32> to vector<8x784xf32>
    %34 = arith.addf %31, %33 : vector<8x784xf32>
    %cst_25 = arith.constant 5.000000e-01 : f32
    %35 = vector.broadcast %cst_25 : f32 to vector<8x784xf32>
    %36 = arith.mulf %34, %35 : vector<8x784xf32>
    %37 = math.tanh %36 : vector<8x784xf32>
    %cst_26 = arith.constant 1.000000e+00 : f32
    %38 = vector.broadcast %cst_26 : f32 to vector<8x784xf32>
    %39 = arith.addf %37, %38 : vector<8x784xf32>
    %cst_27 = arith.constant 5.000000e-01 : f32
    %40 = vector.broadcast %cst_27 : f32 to vector<8x784xf32>
    %41 = arith.mulf %40, %39 : vector<8x784xf32>
    %42 = arith.truncf %41 : vector<8x784xf32> to vector<8x784xbf16>
    %c0_28 = arith.constant 0 : index
    %c0_29 = arith.constant 0 : index
    %43 = vector.load %arg11[%c0_28, %c0_29] : memref<8x784xbf16, #tpu.memory_space<vmem>>, vector<8x784xbf16>
    tpu.vector_store %arg11[%c0_28, %c0_29], %42 {strides = array<i32>} : memref<8x784xbf16, #tpu.memory_space<vmem>>, vector<8x784xbf16>,
    %c0_30 = arith.constant 0 : index
    %c0_31 = arith.constant 0 : index
    %44 = vector.load %arg12[%c0_30, %c0_31] : memref<8x128xf32, #tpu.memory_space<vmem>>, vector<8x128xf32>
    tpu.vector_store %arg12[%c0_30, %c0_31], %12 {strides = array<i32>} : memref<8x128xf32, #tpu.memory_space<vmem>>, vector<8x128xf32>,
    return
  }
  func.func @transform_0(%arg0: i32) -> (i32, i32) {
    %c0_i32 = arith.constant 0 : i32
    %c0_i32_0 = arith.constant 0 : i32
    return %arg0, %c0_i32 : i32, i32
  }
  func.func @transform_1(%arg0: i32) -> (i32, i32) {
    %c0_i32 = arith.constant 0 : i32
    %c0_i32_0 = arith.constant 0 : i32
    return %arg0, %c0_i32 : i32, i32
  }
  func.func @transform_2(%arg0: i32) -> (i32, i32) {
    %c0_i32 = arith.constant 0 : i32
    %c0_i32_0 = arith.constant 0 : i32
    %c0_i32_1 = arith.constant 0 : i32
    return %c0_i32, %c0_i32_0 : i32, i32
  }
  func.func @transform_3(%arg0: i32) -> (i32, i32) {
    %c0_i32 = arith.constant 0 : i32
    %c0_i32_0 = arith.constant 0 : i32
    %c0_i32_1 = arith.constant 0 : i32
    return %c0_i32, %c0_i32_0 : i32, i32
  }
  func.func @transform_4(%arg0: i32) -> (i32, i32) {
    %c0_i32 = arith.constant 0 : i32
    %c0_i32_0 = arith.constant 0 : i32
    %c0_i32_1 = arith.constant 0 : i32
    return %c0_i32, %c0_i32_0 : i32, i32
  }
  func.func @transform_5(%arg0: i32) -> (i32, i32) {
    %c0_i32 = arith.constant 0 : i32
    %c0_i32_0 = arith.constant 0 : i32
    %c0_i32_1 = arith.constant 0 : i32
    return %c0_i32, %c0_i32_0 : i32, i32
  }
  func.func @transform_6(%arg0: i32) -> (i32, i32) {
    %c0_i32 = arith.constant 0 : i32
    %c0_i32_0 = arith.constant 0 : i32
    %c0_i32_1 = arith.constant 0 : i32
    return %c0_i32, %c0_i32_0 : i32, i32
  }
  func.func @transform_7(%arg0: i32) -> (i32, i32) {
    %c0_i32 = arith.constant 0 : i32
    %c0_i32_0 = arith.constant 0 : i32
    %c0_i32_1 = arith.constant 0 : i32
    return %c0_i32, %c0_i32_0 : i32, i32
  }
  func.func @transform_8(%arg0: i32) -> (i32, i32) {
    %c0_i32 = arith.constant 0 : i32
    %c0_i32_0 = arith.constant 0 : i32
    %c0_i32_1 = arith.constant 0 : i32
    return %c0_i32, %c0_i32_0 : i32, i32
  }
  func.func @transform_9(%arg0: i32) -> (i32, i32) {
    %c0_i32 = arith.constant 0 : i32
    %c0_i32_0 = arith.constant 0 : i32
    %c0_i32_1 = arith.constant 0 : i32
    return %c0_i32, %c0_i32_0 : i32, i32
  }
  func.func @transform_10(%arg0: i32) -> (i32, i32) {
    %c0_i32 = arith.constant 0 : i32
    %c0_i32_0 = arith.constant 0 : i32
    return %arg0, %c0_i32 : i32, i32
  }
  func.func @transform_11(%arg0: i32) -> (i32, i32) {
    %c0_i32 = arith.constant 0 : i32
    %c0_i32_0 = arith.constant 0 : i32
    return %arg0, %c0_i32 : i32, i32
  }
}

</mosaic_0001>

<bundles_post_ra>
// kernel: fwd_jit.1
= control target key start
LH: loop header
LB: loop body
LE: loop exit
PB: predicated region body
PF: predicated region fallthrough
CT: control target
= control target key end

     0   :  { %s7618_s0 = inlined_call_operand.vmem [shape: bf16[16,784], index: 0, kind: input, shape index: {}]   ;;  %s7619_s1 = inlined_call_operand.vmem [shape: f32[16,64], index: 1, kind: input, shape index: {}]   ;;  %s7620_s2 = inlined_call_operand.vmem [shape: bf16[784,512], index: 2, kind: input, shape index: {}]   ;;  %s7621_s3 = inlined_call_operand.vmem [shape: f32[1,512], index: 3, kind: input, shape index: {}]   ;;  %s7622_s4 = inlined_call_operand.vmem [shape: f32[512,128], index: 4, kind: input, shape index: {}]   ;;  %s7623_s5 = inlined_call_operand.vmem [shape: f32[1,128], index: 5, kind: input, shape index: {}]   ;;  %s7624_s6 = inlined_call_operand.vmem [shape: bf16[64,512], index: 6, kind: input, shape index: {}]   ;;  %s7625_s7 = inlined_call_operand.vmem [shape: f32[1,512], index: 7, kind: input, shape index: {}]   ;;  %s7626_s8 = inlined_call_operand.vmem [shape: bf16[512,784], index: 8, kind: input, shape index: {}]   ;;  %s7627_s9 = inlined_call_operand.vmem [shape: f32[1,784], index: 9, kind: input, shape index: {}]   ;;  %s7628_s10 = inlined_call_operand.hbm [shape: bf16[16,784], index: 10, kind: output, shape index: {0}]   ;;  %s7629_s11 = inlined_call_operand.vmem [shape: f32[16,128], index: 11, kind: output, shape index: {1}]  }
   0x1   :  { %7633 = sst [smem:[#allocation8_spill]] %s7618_s0 }
   0x2   :  { %17 = vsyncpa [#allocation3], 0 }
   0x3   :  { %19 = vsyncpa [#allocation3 + $0x1], 0  ;;  %s5883_s17 = smov 0   ;;  %s5885_s18 = smov 0  }
   0x4   :  { %s5887_s19 = smov 0   ;;  %s5889_s20 = smov 0  }
   0x5 LB: > { %7634 = sst [smem:[#allocation5_spill]] %s5814_s19  ;;  %s5904_s21 = sadd.s32 4294967295, %s5818_s20   ;;  %s5818_s20 = sphi %s5889_s20, %s7640_s20   ;;  %s5814_s19 = sphi %s5887_s19, %s7642_s19   ;;  %s5810_s18 = sphi %s5885_s18, %s7644_s18   ;;  %s5806_s17 = sphi %s5883_s17, %s7643_s17  }
   0x6   : > { %s4361_s22 = sadd.s32 4294967294, %s5818_s20   ;;  %s5908_s23 = sadd.s32 1, %s5818_s20  }
   0x7   : > { %7635 = sst [smem:[#allocation6_spill]] %s5908_s23  ;;  %s252_s24 = sadd.s32 1, %s5814_s19 }
   0x8   : > { %s249_s25 = ssub.s32 %s5818_s20, %s5908_s23  ;;  %p262_p0 = scmp.ne.s32.totalorder %s5814_s19, %s5810_s18 }
   0x9   : > { %p250_p1 = scmp.eq.s32.totalorder %s249_s25, 0  ;;  %p263_p2 = scmp.eq.s32.totalorder %s5904_s21, 1 }
   0xa   : > { %p268_p3 = scmp.ne.s32.totalorder %s5810_s18, %s5806_s17  ;;  %p269_p4 = scmp.eq.s32.totalorder %s4361_s22, 1 }
   0xb   : > { %s5919_s26 = scalar_select %p250_p1, %s5814_s19, %s252_s24  }
   0xc   : > { %p5921_p5 = por %p263_p2, %p262_p0  ;;  %p5925_p6 = por %p269_p4, %p268_p3 }
   0xd   : > { %7636 = sst [smem:[#allocation7_spill]] %s5919_s26  ;;  %p4364_p7 = scmp.ge.s32.totalorder %s5818_s20, 1 }
   0xe   : > { %p352_p8 = scmp.lt.s32.totalorder %s5818_s20, 3 }
  0x10   : > { %p353_p9 = pnand %p4364_p7, %p352_p8 }
  0x11   : > { %v5095_v0 = vld [vmem:[%s7620_s2 + $0x4] ss:$16 sps:$4 sm:$0xff] (!%p353_p9)   ;;  %v5097_v1 = vld [vmem:[%s7620_s2 + $0xc] ss:$16 sps:$4 sm:$0xff] (!%p353_p9)   ;;  %v5099_v2 = vld [vmem:[%s7620_s2] ss:$16 sps:$4 sm:$0xff] (!%p353_p9)  }
  0x12   : > { %356 = sbr.rel (%p353_p9) target bundleno = 1485 (0x5cd), region = 60  ;;  %1644 = vmatprep.subr.bf16.mxu0 (!%p353_p9), %v5095_v0  ;;  %v5100_v3 = vld [vmem:[%s7620_s2 + $0x8] ss:$16 sps:$4 sm:$0xff] (!%p353_p9)   ;;  %1808 = vmatprep.subr.bf16.mxu1 (!%p353_p9), %v5097_v1  ;;  %v5101_v4 = vld [vmem:[%s7620_s2 + $0x24] ss:$16 sps:$4 sm:$0xff] (!%p353_p9)   ;;  %p400_p10 = scmp.lt.s32.totalorder (!%p353_p9), %s5904_s21, 1 }
  0x13   : > { %1645 = vmatpush1.bf16.msra.mxu0 (!%p353_p9), %v5099_v2  ;;  %1809 = vmatpush1.bf16.msra.mxu1 (!%p353_p9), %v5100_v3  ;;  %v5103_v5 = vld [vmem:[%s7620_s2 + $0x2c] ss:$16 sps:$4 sm:$0xff] (!%p353_p9)   ;;  %v5105_v6 = vld [vmem:[%s7620_s2 + $0x20] ss:$16 sps:$4 sm:$0xff] (!%p353_p9)   ;;  %v5106_v7 = vld [vmem:[%s7620_s2 + $0x28] ss:$16 sps:$4 sm:$0xff] (!%p353_p9)  }
  0x14   : > { %1646 = vmatprep.subr.bf16.mxu0 (!%p353_p9), %v5101_v4  ;;  %1810 = vmatprep.subr.bf16.mxu1 (!%p353_p9), %v5103_v5  ;;  %v5107_v8 = vld [vmem:[%s7620_s2 + $0x44] ss:$16 sps:$4 sm:$0xff] (!%p353_p9)   ;;  %v5109_v9 = vld [vmem:[%s7620_s2 + $0x4c] ss:$16 sps:$4 sm:$0xff] (!%p353_p9)   ;;  %v5111_v10 = vld [vmem:[%s7620_s2 + $0x40] ss:$16 sps:$4 sm:$0xff] (!%p353_p9)  }
  0x15   : > { %v5112_v11 = vld [vmem:[%s7620_s2 + $0x48] ss:$16 sps:$4 sm:$0xff] (!%p353_p9)   ;;  %v5113_v12 = vld [vmem:[%s7620_s2 + $0x64] ss:$16 sps:$4 sm:$0xff] (!%p353_p9)   ;;  %v5115_v13 = vld [vmem:[%s7620_s2 + $0x6c] ss:$16 sps:$4 sm:$0xff] (!%p353_p9)  }
  0x16   : > { %v5117_v14 = vld [vmem:[%s7620_s2 + $0x60] ss:$16 sps:$4 sm:$0xff] (!%p353_p9)   ;;  %v5118_v15 = vld [vmem:[%s7620_s2 + $0x68] ss:$16 sps:$4 sm:$0xff] (!%p353_p9)   ;;  %v5119_v16 = vld [vmem:[%s7620_s2 + $0x84] ss:$16 sps:$4 sm:$0xff] (!%p353_p9)  }
  0x17   : > { %1647 = vmatpush1.bf16.msra.mxu0 (!%p353_p9), %v5105_v6  ;;  %1811 = vmatpush1.bf16.msra.mxu1 (!%p353_p9), %v5106_v7  ;;  %v5121_v17 = vld [vmem:[%s7620_s2 + $0x8c] ss:$16 sps:$4 sm:$0xff] (!%p353_p9)   ;;  %v5123_v18 = vld [vmem:[%s7620_s2 + $0x80] ss:$16 sps:$4 sm:$0xff] (!%p353_p9)   ;;  %v5124_v19 = vld [vmem:[%s7620_s2 + $0x88] ss:$16 sps:$4 sm:$0xff] (!%p353_p9)  }
  0x18   : > { %1648 = vmatprep.subr.bf16.mxu0 (!%p353_p9), %v5107_v8  ;;  %1812 = vmatprep.subr.bf16.mxu1 (!%p353_p9), %v5109_v9  ;;  %v5125_v20 = vld [vmem:[%s7620_s2 + $0xa4] ss:$16 sps:$4 sm:$0xff] (!%p353_p9)   ;;  %v5127_v21 = vld [vmem:[%s7620_s2 + $0xac] ss:$16 sps:$4 sm:$0xff] (!%p353_p9)   ;;  %v5129_v22 = vld [vmem:[%s7620_s2 + $0xa0] ss:$16 sps:$4 sm:$0xff] (!%p353_p9)  }
  0x19   : > { %v5130_v23 = vld [vmem:[%s7620_s2 + $0xa8] ss:$16 sps:$4 sm:$0xff]   ;;  %v5131_v24 = vld [vmem:[%s7620_s2 + $0xc4] ss:$16 sps:$4 sm:$0xff]   ;;  %v5133_v25 = vld [vmem:[%s7620_s2 + $0xcc] ss:$16 sps:$4 sm:$0xff]  }
  0x1a   : > { %v5135_v26 = vld [vmem:[%s7620_s2 + $0xc0] ss:$16 sps:$4 sm:$0xff]   ;;  %v5136_v27 = vld [vmem:[%s7620_s2 + $0xc8] ss:$16 sps:$4 sm:$0xff]   ;;  %v5137_v28 = vld [vmem:[%s7620_s2 + $0xe4] ss:$16 sps:$4 sm:$0xff]  }
  0x1b   : > { %1649 = vmatpush1.bf16.msra.mxu0 %v5111_v10  ;;  %1813 = vmatpush1.bf16.msra.mxu1 %v5112_v11  ;;  %v5139_v29 = vld [vmem:[%s7620_s2 + $0xec] ss:$16 sps:$4 sm:$0xff]   ;;  %v5141_v30 = vld [vmem:[%s7620_s2 + $0xe0] ss:$16 sps:$4 sm:$0xff]   ;;  %v5142_v31 = vld [vmem:[%s7620_s2 + $0xe8] ss:$16 sps:$4 sm:$0xff]  }
  0x1c   : > { %1650 = vmatprep.subr.bf16.mxu0 %v5113_v12  ;;  %1814 = vmatprep.subr.bf16.mxu1 %v5115_v13  ;;  %v5143_v32 = vld [vmem:[%s7620_s2 + $0x104] ss:$16 sps:$4 sm:$0xff]   ;;  %v5145_v33 = vld [vmem:[%s7620_s2 + $0x10c] ss:$16 sps:$4 sm:$0xff]   ;;  %v5147_v34 = vld [vmem:[%s7620_s2 + $0x100] ss:$16 sps:$4 sm:$0xff]  }
  0x1d   : > { %v5148_v35 = vld [vmem:[%s7620_s2 + $0x108] ss:$16 sps:$4 sm:$0xff]   ;;  %s6041_s12 = scalar_select %p400_p10, %s5904_s21, 1  ;;  %v5149_v36 = vld [vmem:[%s7620_s2 + $0x124] ss:$16 sps:$4 sm:$0xff]   ;;  %vm1640_vm0 = vcmask 130048  }
  0x1e   : > { %v5151_v37 = vld [vmem:[%s7620_s2 + $0x12c] ss:$16 sps:$4 sm:$0xff]   ;;  %v5153_v38 = vld [vmem:[%s7620_s2 + $0x120] ss:$16 sps:$4 sm:$0xff]   ;;  %v5154_v39 = vld [vmem:[%s7620_s2 + $0x128] ss:$16 sps:$4 sm:$0xff]  }
  0x1f   : > { %1651 = vmatpush1.bf16.msra.mxu0 %v5117_v14  ;;  %1815 = vmatpush1.bf16.msra.mxu1 %v5118_v15  ;;  %s5052_s25 = smul.u32 28, %s6041_s12  ;;  %v5155_v40 = vld [vmem:[%s7620_s2 + $0x144] ss:$16 sps:$4 sm:$0xff]   ;;  %v5157_v41 = vld [vmem:[%s7620_s2 + $0x14c] ss:$16 sps:$4 sm:$0xff]   ;;  %s7639_s0 = sld [smem:[#allocation8_spill]] }
  0x20   : > { %1652 = vmatprep.subr.bf16.mxu0 %v5119_v16  ;;  %1816 = vmatprep.subr.bf16.mxu1 %v5121_v17  ;;  %v5159_v42 = vld [vmem:[%s7620_s2 + $0x140] ss:$16 sps:$4 sm:$0xff]   ;;  %v5160_v43 = vld [vmem:[%s7620_s2 + $0x148] ss:$16 sps:$4 sm:$0xff]   ;;  %v5161_v44 = vld [vmem:[%s7620_s2 + $0x164] ss:$16 sps:$4 sm:$0xff]  }
  0x21   : > { %v5163_v45 = vld [vmem:[%s7620_s2 + $0x16c] ss:$16 sps:$4 sm:$0xff]   ;;  %v5165_v47 = vld [vmem:[%s7620_s2 + $0x160] ss:$16 sps:$4 sm:$0xff]   ;;  %v5166_v49 = vld [vmem:[%s7620_s2 + $0x168] ss:$16 sps:$4 sm:$0xff]  }
  0x22   : > { %v5167_v50 = vld [vmem:[%s7620_s2 + $0x184] ss:$16 sps:$4 sm:$0xff]   ;;  %v5169_v51 = vld [vmem:[%s7620_s2 + $0x18c] ss:$16 sps:$4 sm:$0xff]   ;;  %v5171_v52 = vld [vmem:[%s7620_s2 + $0x180] ss:$16 sps:$4 sm:$0xff]  }
  0x23   : > { %1653 = vmatpush1.bf16.msra.mxu0 %v5123_v18  ;;  %1817 = vmatpush1.bf16.msra.mxu1 %v5124_v19  ;;  %v5172_v53 = vld [vmem:[%s7620_s2 + $0x188] ss:$16 sps:$4 sm:$0xff]   ;;  %v5173_v54 = vld [vmem:[%s7620_s2 + $0x1a4] ss:$16 sps:$4 sm:$0xff]   ;;  %v5175_v55 = vld [vmem:[%s7620_s2 + $0x1ac] ss:$16 sps:$4 sm:$0xff]  }
  0x24   : > { %1654 = vmatprep.subr.bf16.mxu0 %v5125_v20  ;;  %1818 = vmatprep.subr.bf16.mxu1 %v5127_v21  ;;  %v5177_v56 = vld [vmem:[%s7620_s2 + $0x1a0] ss:$16 sps:$4 sm:$0xff]   ;;  %v5178_v57 = vld [vmem:[%s7620_s2 + $0x1a8] ss:$16 sps:$4 sm:$0xff]   ;;  %v5179_v58 = vld [vmem:[%s7620_s2 + $0x1c4] ss:$16 sps:$4 sm:$0xff]  }
  0x25   : > { %s6071_s23 = scalar_lea.vmem %s7639_s0, %s5052_s25  ;;  %v5181_v59 = vld [vmem:[%s7620_s2 + $0x1cc] ss:$16 sps:$4 sm:$0xff]   ;;  %v5183_v60 = vld [vmem:[%s7620_s2 + $0x1c0] ss:$16 sps:$4 sm:$0xff]   ;;  %v5184_v61 = vld [vmem:[%s7620_s2 + $0x1c8] ss:$16 sps:$4 sm:$0xff]  }
  0x26   : > { %v414_v46 = vld [vmem:[%s6071_s23] sm:$0xff]  ;;  %v5187_v63 = vld [vmem:[%s7620_s2 + $0x1ec] ss:$16 sps:$4 sm:$0xff]   ;;  %v5190_v1 = vld [vmem:[%s7620_s2 + $0x1e8] ss:$16 sps:$4 sm:$0xff]   ;;  %s4366_s30 = sshll.u32 %s6041_s12, 3 }
  0x27   : > { %1655 = vmatpush1.bf16.msra.mxu0 %v5129_v22  ;;  %1819 = vmatpush1.bf16.msra.mxu1 %v5130_v23  ;;  %v4369_v48 = vcombine.high %v414_v46, %v414_v46  ;;  %v5185_v62 = vld [vmem:[%s7620_s2 + $0x1e4] ss:$16 sps:$4 sm:$0xff]   ;;  %v5189_v0 = vld [vmem:[%s7620_s2 + $0x1e0] ss:$16 sps:$4 sm:$0xff]   ;;  %v5199_v3 = vld [vmem:[%s7620_s2 + $0x20c] ss:$16 sps:$4 sm:$0xff]   ;;  %v4368_v4 = vcombine.low %v414_v46, %v414_v46  ;;  %s412_s14 = scalar_lea.vmem %s7629_s11, %s4366_s30  ;;  %s408_s16 = scalar_lea.vmem %s7619_s1, %s4366_s30 }
  0x28   : > { %1656 = vmatprep.subr.bf16.mxu0 %v5131_v24  ;;  %1820 = vmatprep.subr.bf16.mxu1 %v5133_v25  ;;  %v5196_v2 = vld [vmem:[%s7620_s2 + $0x204] ss:$16 sps:$4 sm:$0xff]   ;;  %v5194_v5 = vld [vmem:[%s7620_s2 + $0x200] ss:$16 sps:$4 sm:$0xff]   ;;  %v5197_v6 = vld [vmem:[%s7620_s2 + $0x208] ss:$16 sps:$4 sm:$0xff]  }
  0x29   : > { %1676 = vmatprep.mubr.bf16.mxu0 %v4369_v48  ;;  %1840 = vmatprep.mubr.bf16.mxu1 %v4369_v48  ;;  %v5202_v7 = vld [vmem:[%s7620_s2 + $0x224] ss:$16 sps:$4 sm:$0xff]   ;;  %v5205_v8 = vld [vmem:[%s7620_s2 + $0x22c] ss:$16 sps:$4 sm:$0xff]   ;;  %v5200_v9 = vld [vmem:[%s7620_s2 + $0x220] ss:$16 sps:$4 sm:$0xff]  }
  0x2a   : > { %v5203_v10 = vld [vmem:[%s7620_s2 + $0x228] ss:$16 sps:$4 sm:$0xff]   ;;  %v5208_v11 = vld [vmem:[%s7620_s2 + $0x244] ss:$16 sps:$4 sm:$0xff]   ;;  %v5211_v12 = vld [vmem:[%s7620_s2 + $0x24c] ss:$16 sps:$4 sm:$0xff]  }
  0x2b   : > { %1657 = vmatpush1.bf16.msra.mxu0 %v5135_v26  ;;  %1821 = vmatpush1.bf16.msra.mxu1 %v5136_v27  ;;  %v5206_v13 = vld [vmem:[%s7620_s2 + $0x240] ss:$16 sps:$4 sm:$0xff]   ;;  %v5209_v14 = vld [vmem:[%s7620_s2 + $0x248] ss:$16 sps:$4 sm:$0xff]   ;;  %v5214_v15 = vld [vmem:[%s7620_s2 + $0x264] ss:$16 sps:$4 sm:$0xff]  }
  0x2c   : > { %1658 = vmatprep.subr.bf16.mxu0 %v5137_v28  ;;  %1822 = vmatprep.subr.bf16.mxu1 %v5139_v29  ;;  %v5217_v16 = vld [vmem:[%s7620_s2 + $0x26c] ss:$16 sps:$4 sm:$0xff]   ;;  %v5212_v17 = vld [vmem:[%s7620_s2 + $0x260] ss:$16 sps:$4 sm:$0xff]   ;;  %v5215_v18 = vld [vmem:[%s7620_s2 + $0x268] ss:$16 sps:$4 sm:$0xff]  }
  0x2d   : > { %v5220_v19 = vld [vmem:[%s7620_s2 + $0x284] ss:$16 sps:$4 sm:$0xff]   ;;  %v5223_v20 = vld [vmem:[%s7620_s2 + $0x28c] ss:$16 sps:$4 sm:$0xff]   ;;  %v5218_v21 = vld [vmem:[%s7620_s2 + $0x280] ss:$16 sps:$4 sm:$0xff]  }
  0x2e   : > { %v5221_v22 = vld [vmem:[%s7620_s2 + $0x288] ss:$16 sps:$4 sm:$0xff]   ;;  %v5226_v23 = vld [vmem:[%s7620_s2 + $0x2a4] ss:$16 sps:$4 sm:$0xff]   ;;  %v5229_v24 = vld [vmem:[%s7620_s2 + $0x2ac] ss:$16 sps:$4 sm:$0xff]  }
  0x2f   : > { %1659 = vmatpush1.bf16.msra.mxu0 %v5141_v30  ;;  %1823 = vmatpush1.bf16.msra.mxu1 %v5142_v31  ;;  %v5224_v25 = vld [vmem:[%s7620_s2 + $0x2a0] ss:$16 sps:$4 sm:$0xff]   ;;  %v5227_v26 = vld [vmem:[%s7620_s2 + $0x2a8] ss:$16 sps:$4 sm:$0xff]   ;;  %v5232_v27 = vld [vmem:[%s7620_s2 + $0x2c4] ss:$16 sps:$4 sm:$0xff]  }
  0x30   : > { %1660 = vmatprep.subr.bf16.mxu0 %v5143_v32  ;;  %1824 = vmatprep.subr.bf16.mxu1 %v5145_v33  ;;  %v5235_v28 = vld [vmem:[%s7620_s2 + $0x2cc] ss:$16 sps:$4 sm:$0xff]   ;;  %v5230_v30 = vld [vmem:[%s7620_s2 + $0x2c0] ss:$16 sps:$4 sm:$0xff]   ;;  %v5233_v31 = vld [vmem:[%s7620_s2 + $0x2c8] ss:$16 sps:$4 sm:$0xff]  }
  0x31   : > { %v6213_v29 = vld [vmem:[%s6071_s23 + $0x8] sm:$0xff]  ;;  %v5238_v33 = vld [vmem:[%s7620_s2 + $0x2e4] ss:$16 sps:$4 sm:$0xff]   ;;  %vm2316_vm1 = vcmask 523264   ;;  %vm4241_vm2 = vcmask 125952   ;;  %s5053_s22 = smul.u32 448, %s5904_s21 }
  0x32   : > { %v4371_v32 = vcombine.high %v6213_v29, %v6213_v29  ;;  %v5259_v46 = vld [vmem:[%s7620_s2 + $0x34c] ss:$16 sps:$4 sm:$0xff]   ;;  %v5257_v48 = vld [vmem:[%s7620_s2 + $0x348] ss:$16 sps:$4 sm:$0xff]   ;;  %s5822_s21 = smov [#allocation2]  }
  0x33   : > { %1661 = vmatpush1.bf16.msra.mxu0 %v5147_v34  ;;  %1825 = vmatpush1.bf16.msra.mxu1 %v5148_v35  ;;  %v5241_v34 = vld [vmem:[%s7620_s2 + $0x2ec] ss:$16 sps:$4 sm:$0xff]   ;;  %v5236_v35 = vld [vmem:[%s7620_s2 + $0x2e0] ss:$16 sps:$4 sm:$0xff]   ;;  %s7573_s30 = scalar_lea.hbm %s7628_s10, %s5053_s22 }
  0x34   : > { %1662 = vmatprep.subr.bf16.mxu0 %v5149_v36  ;;  %1826 = vmatprep.subr.bf16.mxu1 %v5151_v37  ;;  %v5239_v36 = vld [vmem:[%s7620_s2 + $0x2e8] ss:$16 sps:$4 sm:$0xff]   ;;  %v5244_v37 = vld [vmem:[%s7620_s2 + $0x304] ss:$16 sps:$4 sm:$0xff]  }
  0x37   : > { %1663 = vmatpush1.bf16.msra.mxu0 %v5153_v38  ;;  %1827 = vmatpush1.bf16.msra.mxu1 %v5154_v39  ;;  %v5247_v38 = vld [vmem:[%s7620_s2 + $0x30c] ss:$16 sps:$4 sm:$0xff]   ;;  %v5242_v39 = vld [vmem:[%s7620_s2 + $0x300] ss:$16 sps:$4 sm:$0xff]  }
  0x38   : > { %1664 = vmatprep.subr.bf16.mxu0 %v5155_v40  ;;  %1828 = vmatprep.subr.bf16.mxu1 %v5157_v41  ;;  %v5245_v40 = vld [vmem:[%s7620_s2 + $0x308] ss:$16 sps:$4 sm:$0xff]   ;;  %v5250_v41 = vld [vmem:[%s7620_s2 + $0x324] ss:$16 sps:$4 sm:$0xff]  }
  0x3b   : > { %1665 = vmatpush1.bf16.msra.mxu0 %v5159_v42  ;;  %1829 = vmatpush1.bf16.msra.mxu1 %v5160_v43  ;;  %v5253_v42 = vld [vmem:[%s7620_s2 + $0x32c] ss:$16 sps:$4 sm:$0xff]   ;;  %v5248_v43 = vld [vmem:[%s7620_s2 + $0x320] ss:$16 sps:$4 sm:$0xff]  }
  0x3c   : > { %1666 = vmatprep.subr.bf16.mxu0 %v5161_v44  ;;  %1830 = vmatprep.subr.bf16.mxu1 %v5163_v45  ;;  %v5251_v44 = vld [vmem:[%s7620_s2 + $0x328] ss:$16 sps:$4 sm:$0xff]   ;;  %v5256_v45 = vld [vmem:[%s7620_s2 + $0x344] ss:$16 sps:$4 sm:$0xff]  }
  0x3f   : > { %1667 = vmatpush1.bf16.msra.mxu0 %v5165_v47  ;;  %1831 = vmatpush1.bf16.msra.mxu1 %v5166_v49  ;;  %v5254_v47 = vld [vmem:[%s7620_s2 + $0x340] ss:$16 sps:$4 sm:$0xff]   ;;  %v5262_v49 = vld [vmem:[%s7620_s2 + $0x364] ss:$16 sps:$4 sm:$0xff]  }
  0x40   : > { %1668 = vmatprep.subr.bf16.mxu0 %v5167_v50  ;;  %1832 = vmatprep.subr.bf16.mxu1 %v5169_v51  ;;  %v5265_v50 = vld [vmem:[%s7620_s2 + $0x36c] ss:$16 sps:$4 sm:$0xff]   ;;  %v5260_v51 = vld [vmem:[%s7620_s2 + $0x360] ss:$16 sps:$4 sm:$0xff]  }
  0x43   : > { %1669 = vmatpush1.bf16.msra.mxu0 %v5171_v52  ;;  %1833 = vmatpush1.bf16.msra.mxu1 %v5172_v53  ;;  %v5263_v52 = vld [vmem:[%s7620_s2 + $0x368] ss:$16 sps:$4 sm:$0xff]   ;;  %v5268_v53 = vld [vmem:[%s7620_s2 + $0x384] ss:$16 sps:$4 sm:$0xff]  }
  0x44   : > { %1670 = vmatprep.subr.bf16.mxu0 %v5173_v54  ;;  %1834 = vmatprep.subr.bf16.mxu1 %v5175_v55  ;;  %v5271_v54 = vld [vmem:[%s7620_s2 + $0x38c] ss:$16 sps:$4 sm:$0xff]   ;;  %v5266_v55 = vld [vmem:[%s7620_s2 + $0x380] ss:$16 sps:$4 sm:$0xff]  }
  0x47   : > { %1671 = vmatpush1.bf16.msra.mxu0 %v5177_v56  ;;  %1835 = vmatpush1.bf16.msra.mxu1 %v5178_v57  ;;  %v5269_v56 = vld [vmem:[%s7620_s2 + $0x388] ss:$16 sps:$4 sm:$0xff]   ;;  %v5274_v57 = vld [vmem:[%s7620_s2 + $0x3a4] ss:$16 sps:$4 sm:$0xff]  }
  0x48   : > { %1672 = vmatprep.subr.bf16.mxu0 %v5179_v58  ;;  %1836 = vmatprep.subr.bf16.mxu1 %v5181_v59  ;;  %v5277_v58 = vld [vmem:[%s7620_s2 + $0x3ac] ss:$16 sps:$4 sm:$0xff]   ;;  %v5272_v59 = vld [vmem:[%s7620_s2 + $0x3a0] ss:$16 sps:$4 sm:$0xff]  }
  0x4b   : > { %1673 = vmatpush1.bf16.msra.mxu0 %v5183_v60  ;;  %1837 = vmatpush1.bf16.msra.mxu1 %v5184_v61  ;;  %v5275_v60 = vld [vmem:[%s7620_s2 + $0x3a8] ss:$16 sps:$4 sm:$0xff]   ;;  %v5280_v61 = vld [vmem:[%s7620_s2 + $0x3c4] ss:$16 sps:$4 sm:$0xff]  }
  0x4c   : > { %1674 = vmatprep.subr.bf16.mxu0 %v5185_v62  ;;  %1838 = vmatprep.subr.bf16.mxu1 %v5187_v63  ;;  %v5283_v62 = vld [vmem:[%s7620_s2 + $0x3cc] ss:$16 sps:$4 sm:$0xff]   ;;  %v5278_v63 = vld [vmem:[%s7620_s2 + $0x3c0] ss:$16 sps:$4 sm:$0xff]  }
  0x4f   : > { %1675 = vmatpush1.bf16.msra.mxu0 %v5189_v0  ;;  %1839 = vmatpush1.bf16.msra.mxu1 %v5190_v1  ;;  %v5281_v0 = vld [vmem:[%s7620_s2 + $0x3c8] ss:$16 sps:$4 sm:$0xff]   ;;  %v5286_v1 = vld [vmem:[%s7620_s2 + $0x3e4] ss:$16 sps:$4 sm:$0xff]  }
  0x50   : > { %1685 = vmatprep.subr.bf16.mxu0 %v5196_v2  ;;  %1849 = vmatprep.subr.bf16.mxu1 %v5199_v3  ;;  %v5289_v2 = vld [vmem:[%s7620_s2 + $0x3ec] ss:$16 sps:$4 sm:$0xff]   ;;  %v5284_v3 = vld [vmem:[%s7620_s2 + $0x3e0] ss:$16 sps:$4 sm:$0xff]  }
  0x52   : > { %1677 = vmatmul.mubr.bf16.vlgmr.msra.gmra.mrb[0].mxu0 %v4368_v4  ;;  %1841 = vmatmul.mubr.bf16.vlgmr.msra.gmra.mrb[0].mxu1 %v4368_v4  ;;  %v5287_v4 = vld [vmem:[%s7620_s2 + $0x3e8] ss:$16 sps:$4 sm:$0xff]  }
  0x53   : > { %1686 = vmatpush1.bf16.msra.mxu0 %v5194_v5  ;;  %1850 = vmatpush1.bf16.msra.mxu1 %v5197_v6  ;;  %v5294_v5 = vld [vmem:[%s7620_s2 + $0x404] ss:$16 sps:$4 sm:$0xff]   ;;  %v5297_v6 = vld [vmem:[%s7620_s2 + $0x40c] ss:$16 sps:$4 sm:$0xff]  }
  0x54   : > { %1687 = vmatprep.subr.bf16.mxu0 %v5202_v7  ;;  %1851 = vmatprep.subr.bf16.mxu1 %v5205_v8  ;;  %v4370_v7 = vcombine.low %v6213_v29, %v6213_v29  ;;  %v5292_v8 = vld [vmem:[%s7620_s2 + $0x400] ss:$16 sps:$4 sm:$0xff]   ;;  %v5327_v29 = vld [vmem:[%s7620_s2 + $0x4ac] ss:$16 sps:$4 sm:$0xff]  }
  0x55   : > { %1717 = vmatprep.mubr.bf16.mxu0 %v4371_v32  ;;  %1881 = vmatprep.mubr.bf16.mxu1 %v4371_v32  ;;  %v5330_v32 = vld [vmem:[%s7620_s2 + $0x4c4] ss:$16 sps:$4 sm:$0xff]  }
  0x57   : > { %1688 = vmatpush1.bf16.msra.mxu0 %v5200_v9  ;;  %1852 = vmatpush1.bf16.msra.mxu1 %v5203_v10  ;;  %v5295_v9 = vld [vmem:[%s7620_s2 + $0x408] ss:$16 sps:$4 sm:$0xff]   ;;  %v5300_v10 = vld [vmem:[%s7620_s2 + $0x424] ss:$16 sps:$4 sm:$0xff]  }
  0x58   : > { %1689 = vmatprep.subr.bf16.mxu0 %v5208_v11  ;;  %1853 = vmatprep.subr.bf16.mxu1 %v5211_v12  ;;  %v5303_v11 = vld [vmem:[%s7620_s2 + $0x42c] ss:$16 sps:$4 sm:$0xff]   ;;  %v6352_v12 = vld [vmem:[%s6071_s23 + $0x10] sm:$0xff] }
  0x5b   : > { %1690 = vmatpush1.bf16.msra.mxu0 %v5206_v13  ;;  %1854 = vmatpush1.bf16.msra.mxu1 %v5209_v14  ;;  %v4373_v13 = vcombine.high %v6352_v12, %v6352_v12  ;;  %v5298_v14 = vld [vmem:[%s7620_s2 + $0x420] ss:$16 sps:$4 sm:$0xff]  }
  0x5c   : > { %1691 = vmatprep.subr.bf16.mxu0 %v5214_v15  ;;  %1855 = vmatprep.subr.bf16.mxu1 %v5217_v16  ;;  %v5301_v15 = vld [vmem:[%s7620_s2 + $0x428] ss:$16 sps:$4 sm:$0xff]   ;;  %v5306_v16 = vld [vmem:[%s7620_s2 + $0x444] ss:$16 sps:$4 sm:$0xff]  }
  0x5f   : > { %1692 = vmatpush1.bf16.msra.mxu0 %v5212_v17  ;;  %1856 = vmatpush1.bf16.msra.mxu1 %v5215_v18  ;;  %v5309_v17 = vld [vmem:[%s7620_s2 + $0x44c] ss:$16 sps:$4 sm:$0xff]   ;;  %v5304_v18 = vld [vmem:[%s7620_s2 + $0x440] ss:$16 sps:$4 sm:$0xff]  }
  0x60   : > { %1693 = vmatprep.subr.bf16.mxu0 %v5220_v19  ;;  %1857 = vmatprep.subr.bf16.mxu1 %v5223_v20  ;;  %v5307_v19 = vld [vmem:[%s7620_s2 + $0x448] ss:$16 sps:$4 sm:$0xff]   ;;  %v5312_v20 = vld [vmem:[%s7620_s2 + $0x464] ss:$16 sps:$4 sm:$0xff]  }
  0x63   : > { %1694 = vmatpush1.bf16.msra.mxu0 %v5218_v21  ;;  %1858 = vmatpush1.bf16.msra.mxu1 %v5221_v22  ;;  %v5315_v21 = vld [vmem:[%s7620_s2 + $0x46c] ss:$16 sps:$4 sm:$0xff]   ;;  %v5310_v22 = vld [vmem:[%s7620_s2 + $0x460] ss:$16 sps:$4 sm:$0xff]  }
  0x64   : > { %1695 = vmatprep.subr.bf16.mxu0 %v5226_v23  ;;  %1859 = vmatprep.subr.bf16.mxu1 %v5229_v24  ;;  %v5313_v23 = vld [vmem:[%s7620_s2 + $0x468] ss:$16 sps:$4 sm:$0xff]   ;;  %v5318_v24 = vld [vmem:[%s7620_s2 + $0x484] ss:$16 sps:$4 sm:$0xff]  }
  0x67   : > { %1696 = vmatpush1.bf16.msra.mxu0 %v5224_v25  ;;  %1860 = vmatpush1.bf16.msra.mxu1 %v5227_v26  ;;  %v5321_v25 = vld [vmem:[%s7620_s2 + $0x48c] ss:$16 sps:$4 sm:$0xff]   ;;  %v5316_v26 = vld [vmem:[%s7620_s2 + $0x480] ss:$16 sps:$4 sm:$0xff]  }
  0x68   : > { %1697 = vmatprep.subr.bf16.mxu0 %v5232_v27  ;;  %1861 = vmatprep.subr.bf16.mxu1 %v5235_v28  ;;  %v5319_v27 = vld [vmem:[%s7620_s2 + $0x488] ss:$16 sps:$4 sm:$0xff]   ;;  %v5324_v28 = vld [vmem:[%s7620_s2 + $0x4a4] ss:$16 sps:$4 sm:$0xff]  }
  0x6b   : > { %1698 = vmatpush1.bf16.msra.mxu0 %v5230_v30  ;;  %1862 = vmatpush1.bf16.msra.mxu1 %v5233_v31  ;;  %v5322_v30 = vld [vmem:[%s7620_s2 + $0x4a0] ss:$16 sps:$4 sm:$0xff]   ;;  %v5325_v31 = vld [vmem:[%s7620_s2 + $0x4a8] ss:$16 sps:$4 sm:$0xff]  }
  0x6c   : > { %1699 = vmatprep.subr.bf16.mxu0 %v5238_v33  ;;  %1863 = vmatprep.subr.bf16.mxu1 %v5241_v34  ;;  %v5333_v33 = vld [vmem:[%s7620_s2 + $0x4cc] ss:$16 sps:$4 sm:$0xff]   ;;  %v5328_v34 = vld [vmem:[%s7620_s2 + $0x4c0] ss:$16 sps:$4 sm:$0xff]  }
  0x6f   : > { %1700 = vmatpush1.bf16.msra.mxu0 %v5236_v35  ;;  %1864 = vmatpush1.bf16.msra.mxu1 %v5239_v36  ;;  %v5331_v35 = vld [vmem:[%s7620_s2 + $0x4c8] ss:$16 sps:$4 sm:$0xff]   ;;  %v5336_v36 = vld [vmem:[%s7620_s2 + $0x4e4] ss:$16 sps:$4 sm:$0xff]  }
  0x70   : > { %1701 = vmatprep.subr.bf16.mxu0 %v5244_v37  ;;  %1865 = vmatprep.subr.bf16.mxu1 %v5247_v38  ;;  %v5339_v37 = vld [vmem:[%s7620_s2 + $0x4ec] ss:$16 sps:$4 sm:$0xff]   ;;  %v5334_v38 = vld [vmem:[%s7620_s2 + $0x4e0] ss:$16 sps:$4 sm:$0xff]  }
  0x73   : > { %1702 = vmatpush1.bf16.msra.mxu0 %v5242_v39  ;;  %1866 = vmatpush1.bf16.msra.mxu1 %v5245_v40  ;;  %v5337_v39 = vld [vmem:[%s7620_s2 + $0x4e8] ss:$16 sps:$4 sm:$0xff]   ;;  %v5342_v40 = vld [vmem:[%s7620_s2 + $0x504] ss:$16 sps:$4 sm:$0xff]  }
  0x74   : > { %1703 = vmatprep.subr.bf16.mxu0 %v5250_v41  ;;  %1867 = vmatprep.subr.bf16.mxu1 %v5253_v42  ;;  %v5345_v41 = vld [vmem:[%s7620_s2 + $0x50c] ss:$16 sps:$4 sm:$0xff]   ;;  %v5340_v42 = vld [vmem:[%s7620_s2 + $0x500] ss:$16 sps:$4 sm:$0xff]  }
  0x77   : > { %1704 = vmatpush1.bf16.msra.mxu0 %v5248_v43  ;;  %1868 = vmatpush1.bf16.msra.mxu1 %v5251_v44  ;;  %v5343_v43 = vld [vmem:[%s7620_s2 + $0x508] ss:$16 sps:$4 sm:$0xff]   ;;  %v5348_v44 = vld [vmem:[%s7620_s2 + $0x524] ss:$16 sps:$4 sm:$0xff]  }
  0x78   : > { %1705 = vmatprep.subr.bf16.mxu0 %v5256_v45  ;;  %1869 = vmatprep.subr.bf16.mxu1 %v5259_v46  ;;  %v5351_v45 = vld [vmem:[%s7620_s2 + $0x52c] ss:$16 sps:$4 sm:$0xff]   ;;  %v5346_v46 = vld [vmem:[%s7620_s2 + $0x520] ss:$16 sps:$4 sm:$0xff]  }
  0x7b   : > { %1706 = vmatpush1.bf16.msra.mxu0 %v5254_v47  ;;  %1870 = vmatpush1.bf16.msra.mxu1 %v5257_v48  ;;  %v5349_v47 = vld [vmem:[%s7620_s2 + $0x528] ss:$16 sps:$4 sm:$0xff]   ;;  %v5354_v48 = vld [vmem:[%s7620_s2 + $0x544] ss:$16 sps:$4 sm:$0xff]  }
  0x7c   : > { %1707 = vmatprep.subr.bf16.mxu0 %v5262_v49  ;;  %1871 = vmatprep.subr.bf16.mxu1 %v5265_v50  ;;  %v5357_v49 = vld [vmem:[%s7620_s2 + $0x54c] ss:$16 sps:$4 sm:$0xff]   ;;  %v5352_v50 = vld [vmem:[%s7620_s2 + $0x540] ss:$16 sps:$4 sm:$0xff]  }
  0x7f   : > { %1708 = vmatpush1.bf16.msra.mxu0 %v5260_v51  ;;  %1872 = vmatpush1.bf16.msra.mxu1 %v5263_v52  ;;  %v5355_v51 = vld [vmem:[%s7620_s2 + $0x548] ss:$16 sps:$4 sm:$0xff]   ;;  %v5360_v52 = vld [vmem:[%s7620_s2 + $0x564] ss:$16 sps:$4 sm:$0xff]  }
  0x80   : > { %1709 = vmatprep.subr.bf16.mxu0 %v5268_v53  ;;  %1873 = vmatprep.subr.bf16.mxu1 %v5271_v54  ;;  %v5363_v53 = vld [vmem:[%s7620_s2 + $0x56c] ss:$16 sps:$4 sm:$0xff]   ;;  %v5358_v54 = vld [vmem:[%s7620_s2 + $0x560] ss:$16 sps:$4 sm:$0xff]  }
  0x83   : > { %1710 = vmatpush1.bf16.msra.mxu0 %v5266_v55  ;;  %1874 = vmatpush1.bf16.msra.mxu1 %v5269_v56  ;;  %v5361_v55 = vld [vmem:[%s7620_s2 + $0x568] ss:$16 sps:$4 sm:$0xff]   ;;  %v5366_v56 = vld [vmem:[%s7620_s2 + $0x584] ss:$16 sps:$4 sm:$0xff]  }
  0x84   : > { %1711 = vmatprep.subr.bf16.mxu0 %v5274_v57  ;;  %1875 = vmatprep.subr.bf16.mxu1 %v5277_v58  ;;  %v5369_v57 = vld [vmem:[%s7620_s2 + $0x58c] ss:$16 sps:$4 sm:$0xff]   ;;  %v5364_v58 = vld [vmem:[%s7620_s2 + $0x580] ss:$16 sps:$4 sm:$0xff]  }
  0x87   : > { %1712 = vmatpush1.bf16.msra.mxu0 %v5272_v59  ;;  %1876 = vmatpush1.bf16.msra.mxu1 %v5275_v60  ;;  %v5367_v59 = vld [vmem:[%s7620_s2 + $0x588] ss:$16 sps:$4 sm:$0xff]   ;;  %v5372_v60 = vld [vmem:[%s7620_s2 + $0x5a4] ss:$16 sps:$4 sm:$0xff]  }
  0x88   : > { %1713 = vmatprep.subr.bf16.mxu0 %v5280_v61  ;;  %1877 = vmatprep.subr.bf16.mxu1 %v5283_v62  ;;  %v5375_v61 = vld [vmem:[%s7620_s2 + $0x5ac] ss:$16 sps:$4 sm:$0xff]   ;;  %v5370_v62 = vld [vmem:[%s7620_s2 + $0x5a0] ss:$16 sps:$4 sm:$0xff]  }
  0x8b   : > { %1714 = vmatpush1.bf16.msra.mxu0 %v5278_v63  ;;  %1878 = vmatpush1.bf16.msra.mxu1 %v5281_v0  ;;  %v5373_v63 = vld [vmem:[%s7620_s2 + $0x5a8] ss:$16 sps:$4 sm:$0xff]   ;;  %v5378_v0 = vld [vmem:[%s7620_s2 + $0x5c4] ss:$16 sps:$4 sm:$0xff]  }
  0x8c   : > { %1715 = vmatprep.subr.bf16.mxu0 %v5286_v1  ;;  %1879 = vmatprep.subr.bf16.mxu1 %v5289_v2  ;;  %v5381_v1 = vld [vmem:[%s7620_s2 + $0x5cc] ss:$16 sps:$4 sm:$0xff]   ;;  %v5376_v2 = vld [vmem:[%s7620_s2 + $0x5c0] ss:$16 sps:$4 sm:$0xff]  }
  0x8f   : > { %1716 = vmatpush1.bf16.msra.mxu0 %v5284_v3  ;;  %1880 = vmatpush1.bf16.msra.mxu1 %v5287_v4  ;;  %v5379_v3 = vld [vmem:[%s7620_s2 + $0x5c8] ss:$16 sps:$4 sm:$0xff]   ;;  %v5384_v4 = vld [vmem:[%s7620_s2 + $0x5e4] ss:$16 sps:$4 sm:$0xff]  }
  0x90   : > { %1726 = vmatprep.subr.bf16.mxu0 %v5294_v5  ;;  %1890 = vmatprep.subr.bf16.mxu1 %v5297_v6  ;;  %v5387_v5 = vld [vmem:[%s7620_s2 + $0x5ec] ss:$16 sps:$4 sm:$0xff]   ;;  %v5382_v6 = vld [vmem:[%s7620_s2 + $0x5e0] ss:$16 sps:$4 sm:$0xff]  }
  0x92   : > { %1718 = vmatmul.mubr.bf16.vlgmr.msra.gmra.mrb[0].mxu0 %v4370_v7  ;;  %1882 = vmatmul.mubr.bf16.vlgmr.msra.gmra.mrb[0].mxu1 %v4370_v7  ;;  %v5385_v7 = vld [vmem:[%s7620_s2 + $0x5e8] ss:$16 sps:$4 sm:$0xff]  }
  0x93   : > { %1727 = vmatpush1.bf16.msra.mxu0 %v5292_v8  ;;  %1891 = vmatpush1.bf16.msra.mxu1 %v5295_v9  ;;  %v5392_v8 = vld [vmem:[%s7620_s2 + $0x604] ss:$16 sps:$4 sm:$0xff]   ;;  %v5395_v9 = vld [vmem:[%s7620_s2 + $0x60c] ss:$16 sps:$4 sm:$0xff]  }
  0x94   : > { %1728 = vmatprep.subr.bf16.mxu0 %v5300_v10  ;;  %1892 = vmatprep.subr.bf16.mxu1 %v5303_v11  ;;  %v1992_v10 = vld [vmem:[%s7622_s4 + $0x80] sm:$0xff]  ;;  %v1993_v11 = vld [vmem:[%s7622_s4 + $0x88] sm:$0xff] }
  0x95   : > { %1758 = vmatprep.mubr.bf16.mxu0 %v4373_v13  ;;  %1922 = vmatprep.mubr.bf16.mxu1 %v4373_v13  ;;  %v5390_v13 = vld [vmem:[%s7620_s2 + $0x600] ss:$16 sps:$4 sm:$0xff]  }
  0x97   : > { %1729 = vmatpush1.bf16.msra.mxu0 %v5298_v14  ;;  %1893 = vmatpush1.bf16.msra.mxu1 %v5301_v15  ;;  %v5393_v14 = vld [vmem:[%s7620_s2 + $0x608] ss:$16 sps:$4 sm:$0xff]   ;;  %v4372_v15 = vcombine.low %v6352_v12, %v6352_v12  ;;  %v1976_v12 = vld [vmem:[%s7622_s4] sm:$0xff] }
  0x98   : > { %1730 = vmatprep.subr.bf16.mxu0 %v5306_v16  ;;  %1894 = vmatprep.subr.bf16.mxu1 %v5309_v17  ;;  %v4941_v16 = vpack.c.bf16 %v1993_v11, %v1992_v10  ;;  %v5820_v17 = vmov 0  }
  0x9b   : > { %1731 = vmatpush1.bf16.msra.mxu0 %v5304_v18  ;;  %1895 = vmatpush1.bf16.msra.mxu1 %v5307_v19  ;;  %v1977_v18 = vld [vmem:[%s7622_s4 + $0x8] sm:$0xff]  ;;  %v1994_v19 = vld [vmem:[%s7622_s4 + $0x90] sm:$0xff] }
  0x9c   : > { %1732 = vmatprep.subr.bf16.mxu0 %v5312_v20  ;;  %1896 = vmatprep.subr.bf16.mxu1 %v5315_v21  ;;  %v1995_v20 = vld [vmem:[%s7622_s4 + $0x98] sm:$0xff] }
  0x9d   : > { %v5193_v21 = vld [vmem:[%s6071_s23 + $0x18] ss:$0 sps:$4 sm:$0xff]   ;;  %s391_s23 = sand.u32 1, %s5810_s18  }
  0x9e   : > { %s5051_s12 = smul.u32 28, %s391_s23  ;;  %s4245_s26 = scalar_lea.sflag [#allocation3], %s391_s23 }
  0x9f   : > { %1733 = vmatpush1.bf16.msra.mxu0 %v5310_v22  ;;  %1897 = vmatpush1.bf16.msra.mxu1 %v5313_v23  ;;  %v1978_v22 = vld [vmem:[%s7622_s4 + $0x10] sm:$0xff]  ;;  %v1979_v23 = vld [vmem:[%s7622_s4 + $0x18] sm:$0xff] }
  0xa0   : > { %1734 = vmatprep.subr.bf16.mxu0 %v5318_v24  ;;  %1898 = vmatprep.subr.bf16.mxu1 %v5321_v25  ;;  %v4943_v24 = vpack.c.bf16 %v1977_v18, %v1976_v12  ;;  %v1996_v25 = vld [vmem:[%s7622_s4 + $0xa0] sm:$0xff]  ;;  %v2009_v18 = vld [vmem:[%s7622_s4 + $0x108] sm:$0xff]  ;;  %s7557_s25 = scalar_lea.vmem [#allocation2], %s5051_s12 }
  0xa1   : > { %v2008_v12 = vld [vmem:[%s7622_s4 + $0x100] sm:$0xff]  ;;  %s4263_s24 = sshll.u32 %s7557_s25, 4  ;;  %s7575_s24 = int_to_ptr.vmem [resolvable:$true] %s4263_s24 }
  0xa2   : > { %s5756_s13 = scalar_lea.vmem %s7575_s24, 448 }
  0xa3   : > { %1735 = vmatpush1.bf16.msra.mxu0 %v5316_v26  ;;  %1899 = vmatpush1.bf16.msra.mxu1 %v5319_v27  ;;  %v1997_v26 = vld [vmem:[%s7622_s4 + $0xa8] sm:$0xff]  ;;  %v4945_v27 = vpack.c.bf16 %v1995_v20, %v1994_v19  ;;  %p5757_p11 = scmp.ne.s32.totalorder %s7575_s24, %s5756_s13 }
  0xa4   : > { %1736 = vmatprep.subr.bf16.mxu0 %v5324_v28  ;;  %1900 = vmatprep.subr.bf16.mxu1 %v5327_v29  ;;  %v1980_v28 = vld [vmem:[%s7622_s4 + $0x20] sm:$0xff]  ;;  %v1981_v29 = vld [vmem:[%s7622_s4 + $0x28] sm:$0xff] }
  0xa5   : > { %p5758_p12 = pnand %p5757_p11, %p5921_p5 }
  0xa7   : > { %1737 = vmatpush1.bf16.msra.mxu0 %v5322_v30  ;;  %1901 = vmatpush1.bf16.msra.mxu1 %v5325_v31  ;;  %v4947_v30 = vpack.c.bf16 %v1979_v23, %v1978_v22  ;;  %v1998_v31 = vld [vmem:[%s7622_s4 + $0xb0] sm:$0xff]  ;;  %p5759_p13 = pneg %p5758_p12 }
  0xa8   : > { %1738 = vmatprep.subr.bf16.mxu0 %v5330_v32  ;;  %1902 = vmatprep.subr.bf16.mxu1 %v5333_v33  ;;  %v1999_v32 = vld [vmem:[%s7622_s4 + $0xb8] sm:$0xff]  ;;  %v4949_v33 = vpack.c.bf16 %v1997_v26, %v1996_v25  ;;  %v2026_v23 = vld [vmem:[%s7622_s4 + $0x190] sm:$0xff] }
  0xab   : > { %1739 = vmatpush1.bf16.msra.mxu0 %v5328_v34  ;;  %1903 = vmatpush1.bf16.msra.mxu1 %v5331_v35  ;;  %v1982_v34 = vld [vmem:[%s7622_s4 + $0x30] sm:$0xff]  ;;  %v1983_v35 = vld [vmem:[%s7622_s4 + $0x38] sm:$0xff] }
  0xac   : > { %1740 = vmatprep.subr.bf16.mxu0 %v5336_v36  ;;  %1904 = vmatprep.subr.bf16.mxu1 %v5339_v37  ;;  %v4951_v36 = vpack.c.bf16 %v1981_v29, %v1980_v28  ;;  %v2000_v37 = vld [vmem:[%s7622_s4 + $0xc0] sm:$0xff]  ;;  %v4975_v28 = vpack.c.bf16 %v2009_v18, %v2008_v12 }
  0xad   : > { %v5398_v18 = vld [vmem:[%s7624_s6 + $0x4] ss:$16 sps:$4 sm:$0xff]  }
  0xaf   : > { %1741 = vmatpush1.bf16.msra.mxu0 %v5334_v38  ;;  %1905 = vmatpush1.bf16.msra.mxu1 %v5337_v39  ;;  %v2001_v38 = vld [vmem:[%s7622_s4 + $0xc8] sm:$0xff]  ;;  %v4953_v39 = vpack.c.bf16 %v1999_v32, %v1998_v31  ;;  %v2010_v31 = vld [vmem:[%s7622_s4 + $0x110] sm:$0xff]  ;;  %v2011_v32 = vld [vmem:[%s7622_s4 + $0x118] sm:$0xff] }
  0xb0   : > { %1742 = vmatprep.subr.bf16.mxu0 %v5342_v40  ;;  %1906 = vmatprep.subr.bf16.mxu1 %v5345_v41  ;;  %v1984_v40 = vld [vmem:[%s7622_s4 + $0x40] sm:$0xff]  ;;  %v1985_v41 = vld [vmem:[%s7622_s4 + $0x48] sm:$0xff] }
  0xb3   : > { %1743 = vmatpush1.bf16.msra.mxu0 %v5340_v42  ;;  %1907 = vmatpush1.bf16.msra.mxu1 %v5343_v43  ;;  %v4955_v42 = vpack.c.bf16 %v1983_v35, %v1982_v34  ;;  %v2002_v43 = vld [vmem:[%s7622_s4 + $0xd0] sm:$0xff]  ;;  %v2028_v34 = vld [vmem:[%s7622_s4 + $0x1a0] sm:$0xff]  ;;  %v2029_v35 = vld [vmem:[%s7622_s4 + $0x1a8] sm:$0xff] }
  0xb4   : > { %1744 = vmatprep.subr.bf16.mxu0 %v5348_v44  ;;  %1908 = vmatprep.subr.bf16.mxu1 %v5351_v45  ;;  %v2003_v44 = vld [vmem:[%s7622_s4 + $0xd8] sm:$0xff]  ;;  %v4957_v45 = vpack.c.bf16 %v2001_v38, %v2000_v37  ;;  %v4981_v37 = vpack.c.bf16 %v2029_v35, %v2028_v34  ;;  %v2012_v38 = vld [vmem:[%s7622_s4 + $0x120] sm:$0xff] }
  0xb7   : > { %1745 = vmatpush1.bf16.msra.mxu0 %v5346_v46  ;;  %1909 = vmatpush1.bf16.msra.mxu1 %v5349_v47  ;;  %v1986_v46 = vld [vmem:[%s7622_s4 + $0x50] sm:$0xff]  ;;  %v1987_v47 = vld [vmem:[%s7622_s4 + $0x58] sm:$0xff] }
  0xb8   : > { %1746 = vmatprep.subr.bf16.mxu0 %v5354_v48  ;;  %1910 = vmatprep.subr.bf16.mxu1 %v5357_v49  ;;  %v4959_v48 = vpack.c.bf16 %v1985_v41, %v1984_v40  ;;  %v2004_v49 = vld [vmem:[%s7622_s4 + $0xe0] sm:$0xff]  ;;  %v2030_v40 = vld [vmem:[%s7622_s4 + $0x1b0] sm:$0xff]  ;;  %v2031_v41 = vld [vmem:[%s7622_s4 + $0x1b8] sm:$0xff] }
  0xbb   : > { %1747 = vmatpush1.bf16.msra.mxu0 %v5352_v50  ;;  %1911 = vmatpush1.bf16.msra.mxu1 %v5355_v51  ;;  %v2005_v50 = vld [vmem:[%s7622_s4 + $0xe8] sm:$0xff]  ;;  %v4961_v51 = vpack.c.bf16 %v2003_v44, %v2002_v43  ;;  %v4985_v43 = vpack.c.bf16 %v2031_v41, %v2030_v40  ;;  %v2014_v44 = vld [vmem:[%s7622_s4 + $0x130] sm:$0xff] }
  0xbc   : > { %1748 = vmatprep.subr.bf16.mxu0 %v5360_v52  ;;  %1912 = vmatprep.subr.bf16.mxu1 %v5363_v53  ;;  %v1988_v52 = vld [vmem:[%s7622_s4 + $0x60] sm:$0xff]  ;;  %v1989_v53 = vld [vmem:[%s7622_s4 + $0x68] sm:$0xff] }
  0xbd   : > { %v5414_v40 = vld [vmem:[%s7624_s6 + $0x60] ss:$16 sps:$4 sm:$0xff]   ;;  %v5417_v41 = vld [vmem:[%s7624_s6 + $0x68] ss:$16 sps:$4 sm:$0xff]  }
  0xbf   : > { %1749 = vmatpush1.bf16.msra.mxu0 %v5358_v54  ;;  %1913 = vmatpush1.bf16.msra.mxu1 %v5361_v55  ;;  %v4963_v54 = vpack.c.bf16 %v1987_v47, %v1986_v46  ;;  %v4965_v55 = vpack.c.bf16 %v2005_v50, %v2004_v49  ;;  %v2032_v46 = vld [vmem:[%s7622_s4 + $0x1c0] sm:$0xff]  ;;  %v2033_v47 = vld [vmem:[%s7622_s4 + $0x1c8] sm:$0xff] }
  0xc0   : > { %1750 = vmatprep.subr.bf16.mxu0 %v5366_v56  ;;  %1914 = vmatprep.subr.bf16.mxu1 %v5369_v57  ;;  %v4967_v56 = vpack.c.bf16 %v1989_v53, %v1988_v52  ;;  %v2006_v57 = vld [vmem:[%s7622_s4 + $0xf0] sm:$0xff]  ;;  %v4989_v49 = vpack.c.bf16 %v2033_v47, %v2032_v46  ;;  %v2016_v50 = vld [vmem:[%s7622_s4 + $0x140] sm:$0xff]  ;;  %v2035_v53 = vld [vmem:[%s7622_s4 + $0x1d8] sm:$0xff] }
  0xc1   : > { %v2034_v52 = vld [vmem:[%s7622_s4 + $0x1d0] sm:$0xff] }
  0xc3   : > { %1751 = vmatpush1.bf16.msra.mxu0 %v5364_v58  ;;  %1915 = vmatpush1.bf16.msra.mxu1 %v5367_v59  ;;  %v2007_v58 = vld [vmem:[%s7622_s4 + $0xf8] sm:$0xff] }
  0xc4   : > { %1752 = vmatprep.subr.bf16.mxu0 %v5372_v60  ;;  %1916 = vmatprep.subr.bf16.mxu1 %v5375_v61  ;;  %v4969_v59 = vpack.c.bf16 %v2007_v58, %v2006_v57  ;;  %v1990_v60 = vld [vmem:[%s7622_s4 + $0x70] sm:$0xff]  ;;  %v1991_v61 = vld [vmem:[%s7622_s4 + $0x78] sm:$0xff]  ;;  %v2036_v58 = vld [vmem:[%s7622_s4 + $0x1e0] sm:$0xff] }
  0xc5   : > { %v2019_v57 = vld [vmem:[%s7622_s4 + $0x158] sm:$0xff] }
  0xc7   : > { %1753 = vmatpush1.bf16.msra.mxu0 %v5370_v62  ;;  %1917 = vmatpush1.bf16.msra.mxu1 %v5373_v63  ;;  %v4971_v62 = vpack.c.bf16 %v1991_v61, %v1990_v60  ;;  %v2024_v63 = vld [vmem:[%s7622_s4 + $0x180] sm:$0xff] }
  0xc8   : > { %1754 = vmatprep.subr.bf16.mxu0 %v5378_v0  ;;  %1918 = vmatprep.subr.bf16.mxu1 %v5381_v1  ;;  %v2025_v0 = vld [vmem:[%s7622_s4 + $0x188] sm:$0xff] }
  0xc9   : > { %v4973_v1 = vpack.c.bf16 %v2025_v0, %v2024_v63  ;;  %v2020_v63 = vld [vmem:[%s7622_s4 + $0x160] sm:$0xff]  ;;  %v2021_v0 = vld [vmem:[%s7622_s4 + $0x168] sm:$0xff] }
  0xcb   : > { %1755 = vmatpush1.bf16.msra.mxu0 %v5376_v2  ;;  %1919 = vmatpush1.bf16.msra.mxu1 %v5379_v3  ;;  %v616_v2 = vlaneseq }
  0xcc   : > { %1756 = vmatprep.subr.bf16.mxu0 %v5384_v4  ;;  %1920 = vmatprep.subr.bf16.mxu1 %v5387_v5  ;;  %v6658_v5 = vld [vmem:[%s7621_s3] sm:$0xf] }
  0xcd   : > { %v6650_v3 = vshrl.u32 %v616_v2, 7  ;;  %v2039_v2 = vld [vmem:[%s7622_s4 + $0x1f8] sm:$0xff] }
  0xcf   : > { %1757 = vmatpush1.bf16.msra.mxu0 %v5382_v6  ;;  %1921 = vmatpush1.bf16.msra.mxu1 %v5385_v7  ;;  %v6653_v4 = vsub.s32 0, %v6650_v3  ;;  %v6661_v6 = vsub.s32 1, %v6650_v3  ;;  %v6664_v7 = vsub.s32 3, %v6650_v3  ;;  %v6747_v61 = vsub.s32 2, %v6650_v3 }
  0xd0   : > { %1767 = vmatprep.subr.bf16.mxu0 %v5392_v8  ;;  %1931 = vmatprep.subr.bf16.mxu1 %v5395_v9 }
  0xd1   : > { %v619_v8 = vrot.slane %v6658_v5, %v6653_v4  ;;  %v623_v9 = vrot.slane %v6658_v5, %v6661_v6  ;;  %v631_v10 = vrot.slane %v6658_v5, %v6664_v7 }
  0xd2   : > { %1759 = vmatmul.mubr.bf16.vlgmr.msra.gmra.mrb[0].mxu0 %v4372_v15  ;;  %1923 = vmatmul.mubr.bf16.vlgmr.msra.gmra.mrb[0].mxu1 %v4372_v15 }
  0xd3   : > { %1768 = vmatpush1.bf16.msra.mxu0 %v5390_v13  ;;  %1932 = vmatpush1.bf16.msra.mxu1 %v5393_v14 }
  0xd4   : > { %1799 = vmatprep.mubr.bf16.mxu0 %v5820_v17  ;;  %1963 = vmatprep.mubr.bf16.mxu1 %v5820_v17 }
  0xd5   : > { %4942 = vmatprep.subr.bf16.mxu1 %v4941_v16  ;;  %2320 = vmatprep.subr.bf16.mxu0 %v5398_v18  ;;  %v5459_v18 = vld [vmem:[%s7626_s8 + $0x158] ss:$28 sps:$4 sm:$0xff]  }
  0xde   : > { %4571 = vmatmul.mubr.msk.bf16.vlgmr.msra.gmra.mrb[0].mxu0 %vm1640_vm0, %v5193_v21  ;;  %4572 = vmatmul.mubr.msk.bf16.vlgmr.msra.gmra.mrb[0].mxu1 %vm1640_vm0, %v5193_v21 }
  0xdf   : > { %4944 = vmatpush3.bf16.msra.mxu1 %v4943_v24  ;;  %2352 = vmatprep.mubr.bf16.mxu0 %v5820_v17  ;;  %v2027_v24 = vld [vmem:[%s7622_s4 + $0x198] sm:$0xff] }
  0xe0   : > { %4946 = vmatprep.subr.bf16.mxu1 %v4945_v27 }
  0xe3   : > { %4948 = vmatpush3.bf16.msra.mxu1 %v4947_v30  ;;  %v4977_v30 = vpack.c.bf16 %v2027_v24, %v2026_v23  ;;  %v5410_v23 = vld [vmem:[%s7624_s6 + $0x44] ss:$16 sps:$4 sm:$0xff]   ;;  %v5413_v24 = vld [vmem:[%s7624_s6 + $0x4c] ss:$16 sps:$4 sm:$0xff]  }
  0xe4   : > { %4950 = vmatprep.subr.bf16.mxu1 %v4949_v33 }
  0xe7   : > { %4952 = vmatpush3.bf16.msra.mxu1 %v4951_v36  ;;  %v4979_v36 = vpack.c.bf16 %v2011_v32, %v2010_v31 }
  0xe8   : > { %4954 = vmatprep.subr.bf16.mxu1 %v4953_v39  ;;  %v2013_v39 = vld [vmem:[%s7622_s4 + $0x128] sm:$0xff] }
  0xeb   : > { %4956 = vmatpush3.bf16.msra.mxu1 %v4955_v42  ;;  %v4983_v42 = vpack.c.bf16 %v2013_v39, %v2012_v38  ;;  %v5416_v38 = vld [vmem:[%s7624_s6 + $0x64] ss:$16 sps:$4 sm:$0xff]   ;;  %v5419_v39 = vld [vmem:[%s7624_s6 + $0x6c] ss:$16 sps:$4 sm:$0xff]  }
  0xec   : > { %4958 = vmatprep.subr.bf16.mxu1 %v4957_v45  ;;  %v2015_v45 = vld [vmem:[%s7622_s4 + $0x138] sm:$0xff] }
  0xef   : > { %4960 = vmatpush3.bf16.msra.mxu1 %v4959_v48  ;;  %v4987_v48 = vpack.c.bf16 %v2015_v45, %v2014_v44  ;;  %v2187_v45 = vld [vmem:[%s408_s16] sm:$0xff] }
  0xf0   : > { %4962 = vmatprep.subr.bf16.mxu1 %v4961_v51  ;;  %v2017_v51 = vld [vmem:[%s7622_s4 + $0x148] sm:$0xff] }
  0xf3   : > { %4964 = vmatpush3.bf16.msra.mxu1 %v4963_v54  ;;  %v4991_v54 = vpack.c.bf16 %v2017_v51, %v2016_v50  ;;  %v5423_v50 = vld [vmem:[%s7626_s8 + $0x8] ss:$28 sps:$4 sm:$0xff]  }
  0xf4   : > { %4966 = vmatprep.subr.bf16.mxu1 %v4965_v55  ;;  %v4993_v55 = vpack.c.bf16 %v2035_v53, %v2034_v52  ;;  %v5428_v52 = vld [vmem:[%s7626_s8 + $0x3c] ss:$28 sps:$4 sm:$0xff]   ;;  %v5431_v53 = vld [vmem:[%s7626_s8 + $0x44] ss:$28 sps:$4 sm:$0xff]  }
  0xf7   : > { %4968 = vmatpush3.bf16.msra.mxu1 %v4967_v56  ;;  %v2018_v56 = vld [vmem:[%s7622_s4 + $0x150] sm:$0xff] }
  0xf8   : > { %4970 = vmatprep.subr.bf16.mxu1 %v4969_v59  ;;  %v2037_v59 = vld [vmem:[%s7622_s4 + $0x1e8] sm:$0xff]  ;;  %v4995_v60 = vpack.c.bf16 %v2019_v57, %v2018_v56  ;;  %v5434_v56 = vld [vmem:[%s7626_s8 + $0x74] ss:$28 sps:$4 sm:$0xff]   ;;  %v5437_v57 = vld [vmem:[%s7626_s8 + $0x7c] ss:$28 sps:$4 sm:$0xff]  }
  0xfb   : > { %4972 = vmatpush3.bf16.msra.mxu1 %v4971_v62  ;;  %v4997_v62 = vpack.c.bf16 %v2037_v59, %v2036_v58  ;;  %v5432_v58 = vld [vmem:[%s7626_s8 + $0x70] ss:$28 sps:$4 sm:$0xff]   ;;  %v5435_v59 = vld [vmem:[%s7626_s8 + $0x78] ss:$28 sps:$4 sm:$0xff]  }
  0xfc   : > { %4974 = vmatprep.subr.bf16.mxu1 %v4973_v1  ;;  %v2038_v1 = vld [vmem:[%s7622_s4 + $0x1f0] sm:$0xff] }
 0x1b1   : > { %v1801_v11 = vpop.f32.mrb[0].mxu0  ;;  %v6672_v13 = vpop.f32.mrb[0].mxu1 }
 0x1b2   : > { %v5005_v14 = vadd.f32 %v1801_v11, %v619_v8  ;;  %v1803_v15 = vpop.f32.mrb[1].mxu0  ;;  %v1967_v16 = vpop.f32.mrb[1].mxu1  ;;  %v4999_v8 = vpack.c.bf16 %v2021_v0, %v2020_v63  ;;  %v2022_v11 = vld [vmem:[%s7622_s4 + $0x170] sm:$0xff]  ;;  %v5438_v63 = vld [vmem:[%s7626_s8 + $0xa8] ss:$28 sps:$4 sm:$0xff]  }
 0x1b3   : > { %v5006_v19 = vadd.f32 %v1803_v15, %v623_v9  ;;  %v5008_v20 = vadd.f32 %v1967_v16, %v631_v10  ;;  %v1805_v21 = vpop.f32.mrb[2].mxu0  ;;  %v1969_v22 = vpop.f32.mrb[2].mxu1  ;;  %v627_v9 = vrot.slane %v6658_v5, %v6747_v61  ;;  %v5001_v10 = vpack.c.bf16 %v2039_v2, %v2038_v1  ;;  %v5396_v5 = vld [vmem:[%s7624_s6] ss:$16 sps:$4 sm:$0xff]   ;;  %v5449_v2 = vld [vmem:[%s7626_s8 + $0xec] ss:$28 sps:$4 sm:$0xff]  }
 0x1b4   : > { %v1806_v25 = vpop.f32.mrb[3].mxu0  ;;  %v1970_v26 = vpop.f32.mrb[3].mxu1  ;;  %v1972_v29 = vmax.f32 %v5005_v14, 0.0  ;;  %v2023_v14 = vld [vmem:[%s7622_s4 + $0x178] sm:$0xff]  ;;  %2321 = vmatpush1.bf16.msra.mxu0 %v5396_v5  ;;  %v5402_v21 = vld [vmem:[%s7624_s6 + $0x20] ss:$16 sps:$4 sm:$0xff]  }
 0x1b5   : > { %v1973_v27 = vmax.f32 %v5006_v19, 0.0  ;;  %v1975_v33 = vmax.f32 %v5008_v20, 0.0  ;;  %v5003_v15 = vpack.c.bf16 %v2023_v14, %v2022_v11  ;;  %v5007_v16 = vadd.f32 %v6672_v13, %v627_v9  ;;  %v5399_v19 = vld [vmem:[%s7624_s6 + $0x8] ss:$16 sps:$4 sm:$0xff]   ;;  %v5401_v13 = vld [vmem:[%s7624_s6 + $0xc] ss:$16 sps:$4 sm:$0xff]  }
 0x1b6   : > { %v5407_v20 = vld [vmem:[%s7624_s6 + $0x2c] ss:$16 sps:$4 sm:$0xff]   ;;  %v5405_v22 = vld [vmem:[%s7624_s6 + $0x28] ss:$16 sps:$4 sm:$0xff]   ;;  %v5408_v25 = vld [vmem:[%s7624_s6 + $0x40] ss:$16 sps:$4 sm:$0xff]  }
 0x1b7   : > { %2111 = vmatprep.mubr.f32.mxu1 %v1973_v27  ;;  %v1974_v12 = vmax.f32 %v5007_v16, 0.0  ;;  %v5411_v26 = vld [vmem:[%s7624_s6 + $0x48] ss:$16 sps:$4 sm:$0xff]   ;;  %v5441_v0 = vld [vmem:[%s7626_s8 + $0xb0] ss:$28 sps:$4 sm:$0xff]  }
 0x1b8   : > { %2112 = vmatmul.mubr.f32.vlgmr.msra.gmra.mrb[4].mxu1 %v1972_v29  ;;  %v5446_v1 = vld [vmem:[%s7626_s8 + $0xe4] ss:$28 sps:$4 sm:$0xff]   ;;  %v5450_v14 = vld [vmem:[%s7626_s8 + $0x118] ss:$28 sps:$4 sm:$0xff]   ;;  %v5456_v5 = vld [vmem:[%s7626_s8 + $0x150] ss:$28 sps:$4 sm:$0xff]  }
 0x1b9   : > { %4976 = vmatpush3.bf16.msra.mxu1 %v4975_v28  ;;  %2181 = vmatprep.mubr.f32.mxu1 %v1975_v33  ;;  %v5447_v9 = vld [vmem:[%s7626_s8 + $0xe8] ss:$28 sps:$4 sm:$0xff]   ;;  %v5458_v16 = vld [vmem:[%s7626_s8 + $0x154] ss:$28 sps:$4 sm:$0xff]  }
 0x1ba   : > { %4978 = vmatprep.subr.bf16.mxu1 %v4977_v30  ;;  %v4573_v30 = vld [vmem:[%s7623_s5] ss:$0 sm:$0xff] }
 0x1bb   : > { %v5455_v11 = vld [vmem:[%s7626_s8 + $0x124] ss:$28 sps:$4 sm:$0xff]  }
 0x1bd   : > { %4980 = vmatpush3.bf16.msra.mxu1 %v4979_v36 }
 0x1be   : > { %4982 = vmatprep.subr.bf16.mxu1 %v4981_v37 }
 0x1c1   : > { %4984 = vmatpush3.bf16.msra.mxu1 %v4983_v42  ;;  %v5422_v42 = vld [vmem:[%s7626_s8 + $0x4] ss:$28 sps:$4 sm:$0xff]  }
 0x1c2   : > { %4986 = vmatprep.subr.bf16.mxu1 %v4985_v43  ;;  %v5425_v43 = vld [vmem:[%s7626_s8 + $0xc] ss:$28 sps:$4 sm:$0xff]  }
 0x1c5   : > { %4988 = vmatpush3.bf16.msra.mxu1 %v4987_v48 }
 0x1c6   : > { %4990 = vmatprep.subr.bf16.mxu1 %v4989_v49  ;;  %v5420_v49 = vld [vmem:[%s7626_s8] ss:$28 sps:$4 sm:$0xff]  }
 0x1c9   : > { %4992 = vmatpush3.bf16.msra.mxu1 %v4991_v54  ;;  %v5426_v54 = vld [vmem:[%s7626_s8 + $0x38] ss:$28 sps:$4 sm:$0xff]  }
 0x1ca   : > { %4994 = vmatprep.subr.bf16.mxu1 %v4993_v55  ;;  %v5429_v55 = vld [vmem:[%s7626_s8 + $0x40] ss:$28 sps:$4 sm:$0xff]  }
 0x1cd   : > { %4996 = vmatpush3.bf16.msra.mxu1 %v4995_v60  ;;  %v5440_v60 = vld [vmem:[%s7626_s8 + $0xac] ss:$28 sps:$4 sm:$0xff]  }
 0x1ce   : > { %4998 = vmatprep.subr.bf16.mxu1 %v4997_v62  ;;  %v5443_v62 = vld [vmem:[%s7626_s8 + $0xb4] ss:$28 sps:$4 sm:$0xff]  }
 0x1d1   : > { %5000 = vmatpush3.bf16.msra.mxu1 %v4999_v8  ;;  %v5444_v8 = vld [vmem:[%s7626_s8 + $0xe0] ss:$28 sps:$4 sm:$0xff]  }
 0x1d2   : > { %5002 = vmatprep.subr.bf16.mxu1 %v5001_v10  ;;  %v5452_v10 = vld [vmem:[%s7626_s8 + $0x11c] ss:$28 sps:$4 sm:$0xff]  }
 0x1d5   : > { %5004 = vmatpush3.bf16.msra.mxu1 %v5003_v15  ;;  %v5453_v15 = vld [vmem:[%s7626_s8 + $0x120] ss:$28 sps:$4 sm:$0xff]  }
 0x1d6   : > { %2361 = vmatprep.subr.bf16.mxu1 %v5401_v13  ;;  %v5467_v13 = vld [vmem:[%s7626_s8 + $0x194] ss:$28 sps:$4 sm:$0xff]  }
 0x1d8   : > { %2182 = vmatmul.mubr.f32.vlgmr.msra.gmra.mrb[6].mxu1 %v1974_v12  ;;  %v5461_v12 = vld [vmem:[%s7626_s8 + $0x15c] ss:$28 sps:$4 sm:$0xff]  }
 0x1d9   : > { %2393 = vmatprep.mubr.bf16.mxu1 %v5820_v17  ;;  %v5404_v17 = vld [vmem:[%s7624_s6 + $0x24] ss:$16 sps:$4 sm:$0xff]   ;;  %2362 = vmatpush1.bf16.msra.mxu1 %v5399_v19  ;;  %v5464_v19 = vld [vmem:[%s7626_s8 + $0x18c] ss:$28 sps:$4 sm:$0xff]  }
 0x1da   : > { %2322 = vmatprep.subr.bf16.mxu0 %v5404_v17  ;;  %2363 = vmatprep.subr.bf16.mxu1 %v5407_v20  ;;  %v5462_v17 = vld [vmem:[%s7626_s8 + $0x188] ss:$28 sps:$4 sm:$0xff]   ;;  %v5465_v20 = vld [vmem:[%s7626_s8 + $0x190] ss:$28 sps:$4 sm:$0xff]  }
 0x1db   : > { %2323 = vmatpush1.bf16.msra.mxu0 %v5402_v21  ;;  %v5470_v21 = vld [vmem:[%s7626_s8 + $0x1c4] ss:$28 sps:$4 sm:$0xff]  }
 0x1dc   : > { %2324 = vmatprep.subr.bf16.mxu0 %v5410_v23  ;;  %v5468_v23 = vld [vmem:[%s7626_s8 + $0x1c0] ss:$28 sps:$4 sm:$0xff]  }
 0x1dd   : > { %2364 = vmatpush1.bf16.msra.mxu1 %v5405_v22  ;;  %v5473_v22 = vld [vmem:[%s7626_s8 + $0x1cc] ss:$28 sps:$4 sm:$0xff]  }
 0x1de   : > { %2365 = vmatprep.subr.bf16.mxu1 %v5413_v24  ;;  %v5471_v24 = vld [vmem:[%s7626_s8 + $0x1c8] ss:$28 sps:$4 sm:$0xff]  }
 0x1df   : > { %2325 = vmatpush1.bf16.msra.mxu0 %v5408_v25  ;;  %v5476_v25 = vld [vmem:[%s7626_s8 + $0x1fc] ss:$28 sps:$4 sm:$0xff]  }
 0x1e0   : > { %2326 = vmatprep.subr.bf16.mxu0 %v5416_v38  ;;  %v5497_v38 = vld [vmem:[%s7626_s8 + $0x2ac] ss:$28 sps:$4 sm:$0xff]  }
 0x1e1   : > { %2366 = vmatpush1.bf16.msra.mxu1 %v5411_v26  ;;  %v5479_v26 = vld [vmem:[%s7626_s8 + $0x204] ss:$28 sps:$4 sm:$0xff]  }
 0x1e2   : > { %2367 = vmatprep.subr.bf16.mxu1 %v5419_v39  ;;  %v5492_v39 = vld [vmem:[%s7626_s8 + $0x2a0] ss:$28 sps:$4 sm:$0xff]  }
 0x1e3   : > { %2327 = vmatpush1.bf16.msra.mxu0 %v5414_v40  ;;  %v5495_v40 = vld [vmem:[%s7626_s8 + $0x2a8] ss:$28 sps:$4 sm:$0xff]  }
 0x1e4   : > { %3855 = vmatprep.subr.bf16.mxu0 %v5422_v42  ;;  %v5503_v42 = vld [vmem:[%s7626_s8 + $0x2e4] ss:$28 sps:$4 sm:$0xff]  }
 0x1e5   : > { %2368 = vmatpush1.bf16.msra.mxu1 %v5417_v41  ;;  %v5500_v41 = vld [vmem:[%s7626_s8 + $0x2dc] ss:$28 sps:$4 sm:$0xff]  }
 0x1e6   : > { %3937 = vmatprep.subr.bf16.mxu1 %v5425_v43  ;;  %v5498_v43 = vld [vmem:[%s7626_s8 + $0x2d8] ss:$28 sps:$4 sm:$0xff]  }
 0x28b   : > { %v4859_v27 = vpop.f32.mrb[4].mxu1 }
 0x28c   : > { %v4860_v28 = vpop.f32.mrb[5].mxu1 }
 0x28d   : > { %v4861_v29 = vadd.f32 %v4860_v28, %v4859_v27  ;;  %v5474_v27 = vld [vmem:[%s7626_s8 + $0x1f8] ss:$28 sps:$4 sm:$0xff]   ;;  %v5477_v28 = vld [vmem:[%s7626_s8 + $0x200] ss:$28 sps:$4 sm:$0xff]  }
 0x28f   : > { %v2114_v33 = vadd.f32 %v4861_v29, %v4573_v30  ;;  %v5482_v29 = vld [vmem:[%s7626_s8 + $0x234] ss:$28 sps:$4 sm:$0xff]   ;;  %v5485_v30 = vld [vmem:[%s7626_s8 + $0x23c] ss:$28 sps:$4 sm:$0xff]  }
 0x2ab   : > { %v4894_v31 = vpop.f32.mrb[6].mxu1 }
 0x2ac   : > { %v4895_v32 = vpop.f32.mrb[7].mxu1 }
 0x2ad   : > { %v4896_v34 = vadd.f32 %v4895_v32, %v4894_v31  ;;  %v5480_v31 = vld [vmem:[%s7626_s8 + $0x230] ss:$28 sps:$4 sm:$0xff]   ;;  %v5483_v32 = vld [vmem:[%s7626_s8 + $0x238] ss:$28 sps:$4 sm:$0xff]  }
 0x2af   : > { %v2184_v35 = vadd.f32 %v4896_v34, %v2114_v33  ;;  %v5488_v33 = vld [vmem:[%s7626_s8 + $0x26c] ss:$28 sps:$4 sm:$0xff]   ;;  %v5491_v34 = vld [vmem:[%s7626_s8 + $0x274] ss:$28 sps:$4 sm:$0xff]  }
 0x2b1   : > { %v2188_v36 = vmul.f32 0.5, %v2184_v35  ;;  %4243 = vst [vmem:[%s412_s14] sm:$0xff] %v2184_v35  ;;  %s5821_s14 = smov 64  }
 0x2b3   : > { %v2189_v37 = vmul.f32 1.442695, %v2188_v36  ;;  %v5489_v36 = vld [vmem:[%s7626_s8 + $0x270] ss:$28 sps:$4 sm:$0xff]  }
 0x2b5   : > { %5740 = vpow2.f32 %v2189_v37  ;;  %v5494_v37 = vld [vmem:[%s7626_s8 + $0x2a4] ss:$28 sps:$4 sm:$0xff]  }
 0x2bf   : > { %v5741_v44 = vpop.eup %5740 }
 0x2c0   : > { %2192 = vrot.lane.b32.xlu0 %v5741_v44, %s5821_s14  ;;  %v5501_v44 = vld [vmem:[%s7626_s8 + $0x2e0] ss:$28 sps:$4 sm:$0xff]   ;;  %s5760_s14 = sshll.u32 %s5822_s21, 4  ;;  %s5761_s14 = int_to_ptr.vmem [resolvable:$false] %s5760_s14 }
 0x2c1   : > { %s5762_s15 = scalar_lea.vmem %s5761_s14, 896  ;;  %p5763_p0 = scmp.lt.s32.totalorder %s7575_s24, %s5761_s14 }
 0x2c2   : > { %p5764_p1 = scmp.lt.s32.totalorder %s5762_s15, %s5756_s13 }
 0x2c4   : > { %p5765_p2 = por %p5764_p1, %p5763_p0 }
 0x2c6   : > { %p5766_p3 = pnand %p5765_p2, %p5759_p13 }
 0x332   : > { %v2193_v46 = vpop.permute.xlu0 %2192 }
 0x333   : > { %v2195_v47 = vmul.f32 %v2193_v46, %v2187_v45  ;;  %v5506_v45 = vld [vmem:[%s7626_s8 + $0x314] ss:$28 sps:$4 sm:$0xff]   ;;  %v5509_v46 = vld [vmem:[%s7626_s8 + $0x31c] ss:$28 sps:$4 sm:$0xff]  }
 0x335   : > { %v2196_v48 = vadd.f32 %v2195_v47, %v2184_v35  ;;  %v5486_v35 = vld [vmem:[%s7626_s8 + $0x268] ss:$28 sps:$4 sm:$0xff]   ;;  %v5504_v47 = vld [vmem:[%s7626_s8 + $0x310] ss:$28 sps:$4 sm:$0xff]  }
 0x337   : > { %v2197_v51 = vpack.c.bf16 %v2196_v48, %v2196_v48  ;;  %v5507_v48 = vld [vmem:[%s7626_s8 + $0x318] ss:$28 sps:$4 sm:$0xff]  }
 0x339   : > { %4590 = vmatmul.mubr.msk.bf16.vlgmr.msra.gmra.mrb[4].mxu0 %vm2316_vm1, %v2197_v51  ;;  %4591 = vmatmul.mubr.msk.bf16.vlgmr.msra.gmra.mrb[8].mxu1 %vm2316_vm1, %v2197_v51  ;;  %v5510_v51 = vld [vmem:[%s7626_s8 + $0x348] ss:$28 sps:$4 sm:$0xff]  }
 0x33a   : > { %3856 = vmatpush1.bf16.msra.mxu0 %v5420_v49  ;;  %3938 = vmatpush1.bf16.msra.mxu1 %v5423_v50  ;;  %v5512_v49 = vld [vmem:[%s7626_s8 + $0x34c] ss:$28 sps:$4 sm:$0xff]   ;;  %v5515_v50 = vld [vmem:[%s7626_s8 + $0x354] ss:$28 sps:$4 sm:$0xff]  }
 0x33b   : > { %3857 = vmatprep.subr.bf16.mxu0 %v5428_v52  ;;  %3939 = vmatprep.subr.bf16.mxu1 %v5431_v53  ;;  %v5513_v52 = vld [vmem:[%s7626_s8 + $0x350] ss:$28 sps:$4 sm:$0xff]   ;;  %v5518_v53 = vld [vmem:[%s7626_s8 + $0x384] ss:$28 sps:$4 sm:$0xff]  }
 0x33e   : > { %3858 = vmatpush1.bf16.msra.mxu0 %v5426_v54  ;;  %3940 = vmatpush1.bf16.msra.mxu1 %v5429_v55  ;;  %v5521_v54 = vld [vmem:[%s7626_s8 + $0x38c] ss:$28 sps:$4 sm:$0xff]   ;;  %v7030_v55 = vld [vmem:[%s7625_s7] sm:$0xf] }
 0x33f   : > { %3859 = vmatprep.subr.bf16.mxu0 %v5434_v56  ;;  %3941 = vmatprep.subr.bf16.mxu1 %v5437_v57  ;;  %v2219_v56 = vrot.slane %v7030_v55, %v6653_v4  ;;  %v2223_v57 = vrot.slane %v7030_v55, %v6661_v6 }
 0x342   : > { %3860 = vmatpush1.bf16.msra.mxu0 %v5432_v58  ;;  %3942 = vmatpush1.bf16.msra.mxu1 %v5435_v59  ;;  %v2231_v58 = vrot.slane %v7030_v55, %v6664_v7 }
 0x343   : > { %3861 = vmatprep.subr.bf16.mxu0 %v5440_v60  ;;  %3943 = vmatprep.subr.bf16.mxu1 %v5443_v62 }
 0x346   : > { %3862 = vmatpush1.bf16.msra.mxu0 %v5438_v63  ;;  %3944 = vmatpush1.bf16.msra.mxu1 %v5441_v0 }
 0x347   : > { %3863 = vmatprep.subr.bf16.mxu0 %v5446_v1  ;;  %3945 = vmatprep.subr.bf16.mxu1 %v5449_v2 }
 0x34a   : > { %3864 = vmatpush1.bf16.msra.mxu0 %v5444_v8  ;;  %3946 = vmatpush1.bf16.msra.mxu1 %v5447_v9 }
 0x34b   : > { %3865 = vmatprep.subr.bf16.mxu0 %v5452_v10  ;;  %3947 = vmatprep.subr.bf16.mxu1 %v5455_v11 }
 0x34e   : > { %3866 = vmatpush1.bf16.msra.mxu0 %v5450_v14  ;;  %3948 = vmatpush1.bf16.msra.mxu1 %v5453_v15 }
 0x34f   : > { %3867 = vmatprep.subr.bf16.mxu0 %v5458_v16  ;;  %3949 = vmatprep.subr.bf16.mxu1 %v5461_v12 }
 0x352   : > { %3868 = vmatpush1.bf16.msra.mxu0 %v5456_v5  ;;  %3950 = vmatpush1.bf16.msra.mxu1 %v5459_v18  ;;  %v5516_v5 = vld [vmem:[%s7626_s8 + $0x380] ss:$28 sps:$4 sm:$0xff]   ;;  %v5519_v18 = vld [vmem:[%s7626_s8 + $0x388] ss:$28 sps:$4 sm:$0xff]  }
 0x353   : > { %3869 = vmatprep.subr.bf16.mxu0 %v5464_v19  ;;  %3951 = vmatprep.subr.bf16.mxu1 %v5467_v13  ;;  %v5524_v13 = vld [vmem:[%s7626_s8 + $0x3bc] ss:$28 sps:$4 sm:$0xff]  }
 0x356   : > { %3870 = vmatpush1.bf16.msra.mxu0 %v5462_v17  ;;  %3952 = vmatpush1.bf16.msra.mxu1 %v5465_v20  ;;  %v5527_v17 = vld [vmem:[%s7626_s8 + $0x3c4] ss:$28 sps:$4 sm:$0xff]  }
 0x357   : > { %3871 = vmatprep.subr.bf16.mxu0 %v5470_v21  ;;  %3953 = vmatprep.subr.bf16.mxu1 %v5473_v22  ;;  %v5522_v21 = vld [vmem:[%s7626_s8 + $0x3b8] ss:$28 sps:$4 sm:$0xff]   ;;  %v5525_v22 = vld [vmem:[%s7626_s8 + $0x3c0] ss:$28 sps:$4 sm:$0xff]  }
 0x35a   : > { %3872 = vmatpush1.bf16.msra.mxu0 %v5468_v23  ;;  %3954 = vmatpush1.bf16.msra.mxu1 %v5471_v24  ;;  %v5530_v23 = vld [vmem:[%s7626_s8 + $0x3f4] ss:$28 sps:$4 sm:$0xff]   ;;  %v5533_v24 = vld [vmem:[%s7626_s8 + $0x3fc] ss:$28 sps:$4 sm:$0xff]  }
 0x35b   : > { %3873 = vmatprep.subr.bf16.mxu0 %v5476_v25  ;;  %3955 = vmatprep.subr.bf16.mxu1 %v5479_v26  ;;  %v5528_v25 = vld [vmem:[%s7626_s8 + $0x3f0] ss:$28 sps:$4 sm:$0xff]   ;;  %v5531_v26 = vld [vmem:[%s7626_s8 + $0x3f8] ss:$28 sps:$4 sm:$0xff]  }
 0x35e   : > { %3874 = vmatpush1.bf16.msra.mxu0 %v5474_v27  ;;  %3956 = vmatpush1.bf16.msra.mxu1 %v5477_v28  ;;  %v5536_v27 = vld [vmem:[%s7626_s8 + $0x42c] ss:$28 sps:$4 sm:$0xff]   ;;  %v5539_v28 = vld [vmem:[%s7626_s8 + $0x434] ss:$28 sps:$4 sm:$0xff]  }
 0x35f   : > { %3875 = vmatprep.subr.bf16.mxu0 %v5482_v29  ;;  %3957 = vmatprep.subr.bf16.mxu1 %v5485_v30  ;;  %v5534_v29 = vld [vmem:[%s7626_s8 + $0x428] ss:$28 sps:$4 sm:$0xff]   ;;  %v5537_v30 = vld [vmem:[%s7626_s8 + $0x430] ss:$28 sps:$4 sm:$0xff]  }
 0x362   : > { %3876 = vmatpush1.bf16.msra.mxu0 %v5480_v31  ;;  %3958 = vmatpush1.bf16.msra.mxu1 %v5483_v32  ;;  %v5542_v31 = vld [vmem:[%s7626_s8 + $0x464] ss:$28 sps:$4 sm:$0xff]   ;;  %v5545_v32 = vld [vmem:[%s7626_s8 + $0x46c] ss:$28 sps:$4 sm:$0xff]  }
 0x363   : > { %3877 = vmatprep.subr.bf16.mxu0 %v5488_v33  ;;  %3959 = vmatprep.subr.bf16.mxu1 %v5491_v34  ;;  %v5540_v33 = vld [vmem:[%s7626_s8 + $0x460] ss:$28 sps:$4 sm:$0xff]   ;;  %v5543_v34 = vld [vmem:[%s7626_s8 + $0x468] ss:$28 sps:$4 sm:$0xff]  }
 0x366   : > { %3878 = vmatpush1.bf16.msra.mxu0 %v5486_v35  ;;  %3960 = vmatpush1.bf16.msra.mxu1 %v5489_v36  ;;  %v5548_v35 = vld [vmem:[%s7626_s8 + $0x49c] ss:$28 sps:$4 sm:$0xff]   ;;  %v5551_v36 = vld [vmem:[%s7626_s8 + $0x4a4] ss:$28 sps:$4 sm:$0xff]  }
 0x367   : > { %3879 = vmatprep.subr.bf16.mxu0 %v5494_v37  ;;  %3961 = vmatprep.subr.bf16.mxu1 %v5497_v38  ;;  %v5546_v37 = vld [vmem:[%s7626_s8 + $0x498] ss:$28 sps:$4 sm:$0xff]   ;;  %v5549_v38 = vld [vmem:[%s7626_s8 + $0x4a0] ss:$28 sps:$4 sm:$0xff]  }
 0x36a   : > { %3880 = vmatpush1.bf16.msra.mxu0 %v5492_v39  ;;  %3962 = vmatpush1.bf16.msra.mxu1 %v5495_v40  ;;  %v5554_v39 = vld [vmem:[%s7626_s8 + $0x4d4] ss:$28 sps:$4 sm:$0xff]   ;;  %v5557_v40 = vld [vmem:[%s7626_s8 + $0x4dc] ss:$28 sps:$4 sm:$0xff]  }
 0x36b   : > { %3881 = vmatprep.subr.bf16.mxu0 %v5500_v41  ;;  %3963 = vmatprep.subr.bf16.mxu1 %v5503_v42  ;;  %v5552_v41 = vld [vmem:[%s7626_s8 + $0x4d0] ss:$28 sps:$4 sm:$0xff]   ;;  %v5555_v42 = vld [vmem:[%s7626_s8 + $0x4d8] ss:$28 sps:$4 sm:$0xff]  }
 0x36e   : > { %3882 = vmatpush1.bf16.msra.mxu0 %v5498_v43  ;;  %3964 = vmatpush1.bf16.msra.mxu1 %v5501_v44  ;;  %v5560_v43 = vld [vmem:[%s7626_s8 + $0x50c] ss:$28 sps:$4 sm:$0xff]   ;;  %v5563_v44 = vld [vmem:[%s7626_s8 + $0x514] ss:$28 sps:$4 sm:$0xff]  }
 0x36f   : > { %3883 = vmatprep.subr.bf16.mxu0 %v5506_v45  ;;  %3965 = vmatprep.subr.bf16.mxu1 %v5509_v46  ;;  %v5558_v45 = vld [vmem:[%s7626_s8 + $0x508] ss:$28 sps:$4 sm:$0xff]   ;;  %v5561_v46 = vld [vmem:[%s7626_s8 + $0x510] ss:$28 sps:$4 sm:$0xff]  }
 0x372   : > { %3884 = vmatpush1.bf16.msra.mxu0 %v5504_v47  ;;  %3966 = vmatpush1.bf16.msra.mxu1 %v5507_v48  ;;  %v5566_v47 = vld [vmem:[%s7626_s8 + $0x544] ss:$28 sps:$4 sm:$0xff]   ;;  %v5569_v48 = vld [vmem:[%s7626_s8 + $0x54c] ss:$28 sps:$4 sm:$0xff]  }
 0x373   : > { %3885 = vmatprep.subr.bf16.mxu0 %v5512_v49  ;;  %3967 = vmatprep.subr.bf16.mxu1 %v5515_v50  ;;  %v5564_v49 = vld [vmem:[%s7626_s8 + $0x540] ss:$28 sps:$4 sm:$0xff]   ;;  %v5567_v50 = vld [vmem:[%s7626_s8 + $0x548] ss:$28 sps:$4 sm:$0xff]  }
 0x376   : > { %3886 = vmatpush1.bf16.msra.mxu0 %v5510_v51  ;;  %3968 = vmatpush1.bf16.msra.mxu1 %v5513_v52  ;;  %v5572_v51 = vld [vmem:[%s7626_s8 + $0x57c] ss:$28 sps:$4 sm:$0xff]   ;;  %v5575_v52 = vld [vmem:[%s7626_s8 + $0x584] ss:$28 sps:$4 sm:$0xff]  }
 0x377   : > { %3896 = vmatprep.subr.bf16.mxu0 %v5518_v53  ;;  %3978 = vmatprep.subr.bf16.mxu1 %v5521_v54  ;;  %v5570_v53 = vld [vmem:[%s7626_s8 + $0x578] ss:$28 sps:$4 sm:$0xff]   ;;  %v5573_v54 = vld [vmem:[%s7626_s8 + $0x580] ss:$28 sps:$4 sm:$0xff]  }
 0x40c   : > { %v2354_v59 = vpop.f32.mrb[4].mxu0  ;;  %v7038_v60 = vpop.f32.mrb[8].mxu1 }
 0x40d   : > { %v2355_v62 = vadd.f32 %v2354_v59, %v2219_v56  ;;  %v2356_v63 = vpop.f32.mrb[5].mxu0  ;;  %v2397_v0 = vpop.f32.mrb[9].mxu1  ;;  %v5578_v56 = vld [vmem:[%s7626_s8 + $0x5b4] ss:$28 sps:$4 sm:$0xff]  }
 0x40e   : > { %v2357_v1 = vadd.f32 %v2356_v63, %v2223_v57  ;;  %v2398_v2 = vadd.f32 %v2397_v0, %v2231_v58  ;;  %v2358_v8 = vpop.f32.mrb[6].mxu0  ;;  %v2399_v9 = vpop.f32.mrb[10].mxu1  ;;  %v5581_v57 = vld [vmem:[%s7626_s8 + $0x5bc] ss:$28 sps:$4 sm:$0xff]   ;;  %v5576_v58 = vld [vmem:[%s7626_s8 + $0x5b0] ss:$28 sps:$4 sm:$0xff]  }
 0x40f   : > { %v2402_v10 = vmax.f32 %v2355_v62, 0.0  ;;  %v2359_v11 = vpop.f32.mrb[7].mxu0  ;;  %v2400_v14 = vpop.f32.mrb[11].mxu1  ;;  %v5579_v59 = vld [vmem:[%s7626_s8 + $0x5b8] ss:$28 sps:$4 sm:$0xff]  }
 0x410   : > { %v2403_v15 = vmax.f32 %v2357_v1, 0.0  ;;  %v2405_v16 = vmax.f32 %v2398_v2, 0.0  ;;  %v5584_v62 = vld [vmem:[%s7626_s8 + $0x5ec] ss:$28 sps:$4 sm:$0xff]   ;;  %v5587_v63 = vld [vmem:[%s7626_s8 + $0x5f4] ss:$28 sps:$4 sm:$0xff]  }
 0x411   : > { %v7048_v19 = vpack.c.bf16 %v2402_v10, %v2402_v10  ;;  %v5582_v0 = vld [vmem:[%s7626_s8 + $0x5e8] ss:$28 sps:$4 sm:$0xff]   ;;  %v5585_v1 = vld [vmem:[%s7626_s8 + $0x5f0] ss:$28 sps:$4 sm:$0xff]   ;;  %v5588_v9 = vld [vmem:[%s7626_s8 + $0x620] ss:$28 sps:$4 sm:$0xff]  }
 0x412   : > { %v7040_v12 = vpack.c.bf16 %v2403_v15, %v2403_v15  ;;  %v7058_v20 = vpack.c.bf16 %v2405_v16, %v2405_v16  ;;  %v5590_v2 = vld [vmem:[%s7626_s8 + $0x624] ss:$28 sps:$4 sm:$0xff]   ;;  %v5593_v8 = vld [vmem:[%s7626_s8 + $0x62c] ss:$28 sps:$4 sm:$0xff]   ;;  %v5596_v11 = vld [vmem:[%s7626_s8 + $0x65c] ss:$28 sps:$4 sm:$0xff]  }
 0x413   : > { %v5591_v10 = vld [vmem:[%s7626_s8 + $0x628] ss:$28 sps:$4 sm:$0xff]   ;;  %v5594_v15 = vld [vmem:[%s7626_s8 + $0x658] ss:$28 sps:$4 sm:$0xff]   ;;  %v5597_v16 = vld [vmem:[%s7626_s8 + $0x660] ss:$28 sps:$4 sm:$0xff]  }
 0x414   : > { %3887 = vmatprep.mubr.bf16.mxu0 %v7040_v12  ;;  %3969 = vmatprep.mubr.bf16.mxu1 %v7040_v12  ;;  %v5599_v14 = vld [vmem:[%s7626_s8 + $0x664] ss:$28 sps:$4 sm:$0xff]  }
 0x415   : > { %3888 = vmatmul.mubr.bf16.vlgmr.msra.gmra.mrb[8].mxu0 %v7048_v19  ;;  %3970 = vmatmul.mubr.bf16.vlgmr.msra.gmra.mrb[12].mxu1 %v7048_v19 }
 0x416   : > { %3897 = vmatpush1.bf16.msra.mxu0 %v5516_v5  ;;  %3979 = vmatpush1.bf16.msra.mxu1 %v5519_v18  ;;  %v2227_v5 = vrot.slane %v7030_v55, %v6747_v61  ;;  %v5602_v18 = vld [vmem:[%s7626_s8 + $0x694] ss:$28 sps:$4 sm:$0xff]  }
 0x417   : > { %3928 = vmatprep.mubr.bf16.mxu0 %v7058_v20  ;;  %4010 = vmatprep.mubr.bf16.mxu1 %v7058_v20  ;;  %v5603_v55 = vld [vmem:[%s7626_s8 + $0x698] ss:$28 sps:$4 sm:$0xff]  }
 0x418   : > { %3898 = vmatprep.subr.bf16.mxu0 %v5524_v13  ;;  %3980 = vmatprep.subr.bf16.mxu1 %v5527_v17  ;;  %v5605_v13 = vld [vmem:[%s7626_s8 + $0x69c] ss:$28 sps:$4 sm:$0xff]   ;;  %v5600_v17 = vld [vmem:[%s7626_s8 + $0x690] ss:$28 sps:$4 sm:$0xff]  }
 0x41a   : > { %3899 = vmatpush1.bf16.msra.mxu0 %v5522_v21  ;;  %3981 = vmatpush1.bf16.msra.mxu1 %v5525_v22  ;;  %v2396_v21 = vadd.f32 %v7038_v60, %v2227_v5  ;;  %v5608_v22 = vld [vmem:[%s7626_s8 + $0x6cc] ss:$28 sps:$4 sm:$0xff]   ;;  %v5670_v5 = vld [vmem:[%s7626_s8 + $0x600] ss:$28 sps:$4 sm:$0xff]  }
 0x41b   : > { %3900 = vmatprep.subr.bf16.mxu0 %v5530_v23  ;;  %3982 = vmatprep.subr.bf16.mxu1 %v5533_v24  ;;  %v5611_v23 = vld [vmem:[%s7626_s8 + $0x6d4] ss:$28 sps:$4 sm:$0xff]   ;;  %v5606_v24 = vld [vmem:[%s7626_s8 + $0x6c8] ss:$28 sps:$4 sm:$0xff]  }
 0x41c   : > { %v5609_v60 = vld [vmem:[%s7626_s8 + $0x6d0] ss:$28 sps:$4 sm:$0xff]  }
 0x41e   : > { %3901 = vmatpush1.bf16.msra.mxu0 %v5528_v25  ;;  %3983 = vmatpush1.bf16.msra.mxu1 %v5531_v26  ;;  %v2404_v25 = vmax.f32 %v2396_v21, 0.0  ;;  %v5614_v26 = vld [vmem:[%s7626_s8 + $0x14] ss:$28 sps:$4 sm:$0xff]  }
 0x41f   : > { %3902 = vmatprep.subr.bf16.mxu0 %v5536_v27  ;;  %3984 = vmatprep.subr.bf16.mxu1 %v5539_v28  ;;  %v5615_v27 = vld [vmem:[%s7626_s8 + $0x1d8] ss:$28 sps:$4 sm:$0xff]   ;;  %v5612_v28 = vld [vmem:[%s7626_s8 + $0x10] ss:$28 sps:$4 sm:$0xff]  }
 0x420   : > { %v5672_v21 = vld [vmem:[%s7626_s8 + $0x2b0] ss:$28 sps:$4 sm:$0xff]  }
 0x422   : > { %3903 = vmatpush1.bf16.msra.mxu0 %v5534_v29  ;;  %3985 = vmatpush1.bf16.msra.mxu1 %v5537_v30  ;;  %v7250_v29 = vpack.c.bf16 %v2404_v25, %v2404_v25  ;;  %v5616_v30 = vld [vmem:[%s7626_s8 + $0x18] ss:$28 sps:$4 sm:$0xff]   ;;  %v5681_v25 = vld [vmem:[%s7626_s8 + $0x4b0] ss:$28 sps:$4 sm:$0xff]  }
 0x423   : > { %3904 = vmatprep.subr.bf16.mxu0 %v5542_v31  ;;  %3986 = vmatprep.subr.bf16.mxu1 %v5545_v32  ;;  %v5619_v31 = vld [vmem:[%s7626_s8 + $0x4c] ss:$28 sps:$4 sm:$0xff]  }
 0x424   : > { %v5620_v32 = vld [vmem:[%s7626_s8 + $0x210] ss:$28 sps:$4 sm:$0xff]  }
 0x426   : > { %3905 = vmatpush1.bf16.msra.mxu0 %v5540_v33  ;;  %3987 = vmatpush1.bf16.msra.mxu1 %v5543_v34  ;;  %v5617_v33 = vld [vmem:[%s7626_s8 + $0x48] ss:$28 sps:$4 sm:$0xff]   ;;  %v5621_v34 = vld [vmem:[%s7626_s8 + $0x50] ss:$28 sps:$4 sm:$0xff]  }
 0x427   : > { %3906 = vmatprep.subr.bf16.mxu0 %v5548_v35  ;;  %3988 = vmatprep.subr.bf16.mxu1 %v5551_v36  ;;  %v5624_v35 = vld [vmem:[%s7626_s8 + $0x84] ss:$28 sps:$4 sm:$0xff]  }
 0x428   : > { %v5625_v36 = vld [vmem:[%s7626_s8 + $0x248] ss:$28 sps:$4 sm:$0xff]  }
 0x42a   : > { %3907 = vmatpush1.bf16.msra.mxu0 %v5546_v37  ;;  %3989 = vmatpush1.bf16.msra.mxu1 %v5549_v38  ;;  %v5622_v37 = vld [vmem:[%s7626_s8 + $0x80] ss:$28 sps:$4 sm:$0xff]  }
 0x42b   : > { %3908 = vmatprep.subr.bf16.mxu0 %v5554_v39  ;;  %3990 = vmatprep.subr.bf16.mxu1 %v5557_v40  ;;  %v5629_v38 = vld [vmem:[%s7626_s8 + $0xbc] ss:$28 sps:$4 sm:$0xff]  }
 0x42c   : > { %v5630_v39 = vld [vmem:[%s7626_s8 + $0x280] ss:$28 sps:$4 sm:$0xff]   ;;  %v5627_v40 = vld [vmem:[%s7626_s8 + $0xb8] ss:$28 sps:$4 sm:$0xff]  }
 0x42e   : > { %3909 = vmatpush1.bf16.msra.mxu0 %v5552_v41  ;;  %3991 = vmatpush1.bf16.msra.mxu1 %v5555_v42  ;;  %v5631_v41 = vld [vmem:[%s7626_s8 + $0xc0] ss:$28 sps:$4 sm:$0xff]   ;;  %v5634_v42 = vld [vmem:[%s7626_s8 + $0xf4] ss:$28 sps:$4 sm:$0xff]  }
 0x42f   : > { %3910 = vmatprep.subr.bf16.mxu0 %v5560_v43  ;;  %3992 = vmatprep.subr.bf16.mxu1 %v5563_v44  ;;  %v5635_v43 = vld [vmem:[%s7626_s8 + $0x2b8] ss:$28 sps:$4 sm:$0xff]   ;;  %v5632_v44 = vld [vmem:[%s7626_s8 + $0xf0] ss:$28 sps:$4 sm:$0xff]  }
 0x432   : > { %3911 = vmatpush1.bf16.msra.mxu0 %v5558_v45  ;;  %3993 = vmatpush1.bf16.msra.mxu1 %v5561_v46  ;;  %v5636_v45 = vld [vmem:[%s7626_s8 + $0xf8] ss:$28 sps:$4 sm:$0xff]   ;;  %v5639_v46 = vld [vmem:[%s7626_s8 + $0x12c] ss:$28 sps:$4 sm:$0xff]  }
 0x433   : > { %3912 = vmatprep.subr.bf16.mxu0 %v5566_v47  ;;  %3994 = vmatprep.subr.bf16.mxu1 %v5569_v48  ;;  %v5640_v47 = vld [vmem:[%s7626_s8 + $0x2f0] ss:$28 sps:$4 sm:$0xff]   ;;  %v5637_v48 = vld [vmem:[%s7626_s8 + $0x128] ss:$28 sps:$4 sm:$0xff]  }
 0x436   : > { %3913 = vmatpush1.bf16.msra.mxu0 %v5564_v49  ;;  %3995 = vmatpush1.bf16.msra.mxu1 %v5567_v50  ;;  %v5641_v49 = vld [vmem:[%s7626_s8 + $0x130] ss:$28 sps:$4 sm:$0xff]   ;;  %v5644_v50 = vld [vmem:[%s7626_s8 + $0x164] ss:$28 sps:$4 sm:$0xff]  }
 0x437   : > { %3914 = vmatprep.subr.bf16.mxu0 %v5572_v51  ;;  %3996 = vmatprep.subr.bf16.mxu1 %v5575_v52  ;;  %v5645_v51 = vld [vmem:[%s7626_s8 + $0x328] ss:$28 sps:$4 sm:$0xff]   ;;  %v5642_v52 = vld [vmem:[%s7626_s8 + $0x160] ss:$28 sps:$4 sm:$0xff]  }
 0x43a   : > { %3915 = vmatpush1.bf16.msra.mxu0 %v5570_v53  ;;  %3997 = vmatpush1.bf16.msra.mxu1 %v5573_v54  ;;  %v5646_v53 = vld [vmem:[%s7626_s8 + $0x168] ss:$28 sps:$4 sm:$0xff]   ;;  %v5649_v54 = vld [vmem:[%s7626_s8 + $0x19c] ss:$28 sps:$4 sm:$0xff]  }
 0x43b   : > { %3916 = vmatprep.subr.bf16.mxu0 %v5578_v56  ;;  %3998 = vmatprep.subr.bf16.mxu1 %v5581_v57  ;;  %v5650_v56 = vld [vmem:[%s7626_s8 + $0x360] ss:$28 sps:$4 sm:$0xff]   ;;  %v5647_v57 = vld [vmem:[%s7626_s8 + $0x198] ss:$28 sps:$4 sm:$0xff]  }
 0x43e   : > { %3917 = vmatpush1.bf16.msra.mxu0 %v5576_v58  ;;  %3999 = vmatpush1.bf16.msra.mxu1 %v5579_v59  ;;  %v5651_v58 = vld [vmem:[%s7626_s8 + $0x1a0] ss:$28 sps:$4 sm:$0xff]   ;;  %v5654_v59 = vld [vmem:[%s7626_s8 + $0x1d4] ss:$28 sps:$4 sm:$0xff]  }
 0x43f   : > { %3918 = vmatprep.subr.bf16.mxu0 %v5584_v62  ;;  %4000 = vmatprep.subr.bf16.mxu1 %v5587_v63  ;;  %v5655_v62 = vld [vmem:[%s7626_s8 + $0x558] ss:$28 sps:$4 sm:$0xff]   ;;  %v5652_v63 = vld [vmem:[%s7626_s8 + $0x1d0] ss:$28 sps:$4 sm:$0xff]  }
 0x442   : > { %3919 = vmatpush1.bf16.msra.mxu0 %v5582_v0  ;;  %4001 = vmatpush1.bf16.msra.mxu1 %v5585_v1  ;;  %v5656_v0 = vld [vmem:[%s7626_s8 + $0x398] ss:$28 sps:$4 sm:$0xff]   ;;  %v5659_v1 = vld [vmem:[%s7626_s8 + $0x20c] ss:$28 sps:$4 sm:$0xff]  }
 0x443   : > { %3920 = vmatprep.subr.bf16.mxu0 %v5590_v2  ;;  %4002 = vmatprep.subr.bf16.mxu1 %v5593_v8  ;;  %v5660_v2 = vld [vmem:[%s7626_s8 + $0x590] ss:$28 sps:$4 sm:$0xff]   ;;  %v5657_v8 = vld [vmem:[%s7626_s8 + $0x208] ss:$28 sps:$4 sm:$0xff]  }
 0x446   : > { %3921 = vmatpush1.bf16.msra.mxu0 %v5588_v9  ;;  %4003 = vmatpush1.bf16.msra.mxu1 %v5591_v10  ;;  %v5661_v9 = vld [vmem:[%s7626_s8 + $0x3d0] ss:$28 sps:$4 sm:$0xff]   ;;  %v5664_v10 = vld [vmem:[%s7626_s8 + $0x244] ss:$28 sps:$4 sm:$0xff]  }
 0x447   : > { %3922 = vmatprep.subr.bf16.mxu0 %v5596_v11  ;;  %4004 = vmatprep.subr.bf16.mxu1 %v5599_v14  ;;  %v5665_v11 = vld [vmem:[%s7626_s8 + $0x5c8] ss:$28 sps:$4 sm:$0xff]   ;;  %v5662_v14 = vld [vmem:[%s7626_s8 + $0x240] ss:$28 sps:$4 sm:$0xff]  }
 0x44a   : > { %3923 = vmatpush1.bf16.msra.mxu0 %v5594_v15  ;;  %4005 = vmatpush1.bf16.msra.mxu1 %v5597_v16  ;;  %v5666_v15 = vld [vmem:[%s7626_s8 + $0x408] ss:$28 sps:$4 sm:$0xff]   ;;  %v5669_v16 = vld [vmem:[%s7626_s8 + $0x27c] ss:$28 sps:$4 sm:$0xff]  }
 0x44b   : > { %3924 = vmatprep.subr.bf16.mxu0 %v5602_v18  ;;  %4006 = vmatprep.subr.bf16.mxu1 %v5605_v13  ;;  %v5667_v18 = vld [vmem:[%s7626_s8 + $0x278] ss:$28 sps:$4 sm:$0xff]   ;;  %v5671_v13 = vld [vmem:[%s7626_s8 + $0x440] ss:$28 sps:$4 sm:$0xff]  }
 0x44e   : > { %3925 = vmatpush1.bf16.msra.mxu0 %v5600_v17  ;;  %4007 = vmatpush1.bf16.msra.mxu1 %v5603_v55  ;;  %v5674_v17 = vld [vmem:[%s7626_s8 + $0x2b4] ss:$28 sps:$4 sm:$0xff]  }
 0x44f   : > { %3926 = vmatprep.subr.bf16.mxu0 %v5608_v22  ;;  %4008 = vmatprep.subr.bf16.mxu1 %v5611_v23  ;;  %v5675_v55 = vld [vmem:[%s7626_s8 + $0x638] ss:$28 sps:$4 sm:$0xff]   ;;  %v5679_v23 = vld [vmem:[%s7626_s8 + $0x2ec] ss:$28 sps:$4 sm:$0xff]  }
 0x450   : > { %v5676_v22 = vld [vmem:[%s7626_s8 + $0x478] ss:$28 sps:$4 sm:$0xff]  }
 0x452   : > { %3927 = vmatpush1.bf16.msra.mxu0 %v5606_v24  ;;  %4009 = vmatpush1.bf16.msra.mxu1 %v5609_v60  ;;  %v5680_v24 = vld [vmem:[%s7626_s8 + $0x670] ss:$28 sps:$4 sm:$0xff]   ;;  %v5677_v60 = vld [vmem:[%s7626_s8 + $0x2e8] ss:$28 sps:$4 sm:$0xff]  }
 0x453   : > { %4019 = vmatprep.subr.bf16.mxu0 %v5614_v26  ;;  %4897 = vmatprep.subr.bf16.mxu1 %v5615_v27  ;;  %v5684_v26 = vld [vmem:[%s7626_s8 + $0x324] ss:$28 sps:$4 sm:$0xff]  }
 0x454   : > { %v5685_v27 = vld [vmem:[%s7626_s8 + $0x6a8] ss:$28 sps:$4 sm:$0xff]  }
 0x455   : > { %3929 = vmatmul.mubr.bf16.vlgmr.msra.gmra.mrb[8].mxu0 %v7250_v29  ;;  %4011 = vmatmul.mubr.bf16.vlgmr.msra.gmra.mrb[12].mxu1 %v7250_v29 }
 0x456   : > { %4020 = vmatpush1.bf16.msra.mxu0 %v5612_v28  ;;  %4051 = vmatprep.mubr.bf16.mxu0 %v7040_v12  ;;  %v5682_v28 = vld [vmem:[%s7626_s8 + $0x320] ss:$28 sps:$4 sm:$0xff]  }
 0x457   : > { %4898 = vmatpush3.bf16.msra.mxu1 %v5616_v30  ;;  %4133 = vmatprep.mubr.bf16.mxu1 %v7040_v12  ;;  %v5626_v12 = vld [vmem:[%s7626_s8 + $0x88] ss:$28 sps:$4 sm:$0xff]  }
 0x458   : > { %4021 = vmatprep.subr.bf16.mxu0 %v5619_v31  ;;  %4899 = vmatprep.subr.bf16.mxu1 %v5620_v32  ;;  %v5686_v30 = vld [vmem:[%s7626_s8 + $0x4e8] ss:$28 sps:$4 sm:$0xff]   ;;  %v5689_v31 = vld [vmem:[%s7626_s8 + $0x35c] ss:$28 sps:$4 sm:$0xff]  }
 0x459   : > { %v5690_v32 = vld [vmem:[%s7626_s8 + $0x6e0] ss:$28 sps:$4 sm:$0xff]  }
 0x45a   : > { %4022 = vmatpush1.bf16.msra.mxu0 %v5617_v33  ;;  %v5687_v33 = vld [vmem:[%s7626_s8 + $0x358] ss:$28 sps:$4 sm:$0xff]  }
 0x45b   : > { %4900 = vmatpush3.bf16.msra.mxu1 %v5621_v34  ;;  %4023 = vmatprep.subr.bf16.mxu0 %v5624_v35  ;;  %v5691_v34 = vld [vmem:[%s7626_s8 + $0x520] ss:$28 sps:$4 sm:$0xff]   ;;  %v5694_v35 = vld [vmem:[%s7626_s8 + $0x394] ss:$28 sps:$4 sm:$0xff]  }
 0x45c   : > { %4901 = vmatprep.subr.bf16.mxu1 %v5625_v36  ;;  %v5692_v36 = vld [vmem:[%s7626_s8 + $0x390] ss:$28 sps:$4 sm:$0xff]  }
 0x45e   : > { %4024 = vmatpush1.bf16.msra.mxu0 %v5622_v37  ;;  %v5697_v37 = vld [vmem:[%s7626_s8 + $0x3cc] ss:$28 sps:$4 sm:$0xff]  }
 0x45f   : > { %4902 = vmatpush3.bf16.msra.mxu1 %v5626_v12  ;;  %4025 = vmatprep.subr.bf16.mxu0 %v5629_v38  ;;  %v5695_v12 = vld [vmem:[%s7626_s8 + $0x3c8] ss:$28 sps:$4 sm:$0xff]  }
 0x460   : > { %4903 = vmatprep.subr.bf16.mxu1 %v5630_v39  ;;  %v5700_v38 = vld [vmem:[%s7626_s8 + $0x404] ss:$28 sps:$4 sm:$0xff]  }
 0x461   : > { %v5698_v39 = vld [vmem:[%s7626_s8 + $0x400] ss:$28 sps:$4 sm:$0xff]  }
 0x462   : > { %4026 = vmatpush1.bf16.msra.mxu0 %v5627_v40  ;;  %v5706_v40 = vld [vmem:[%s7626_s8 + $0x474] ss:$28 sps:$4 sm:$0xff]  }
 0x463   : > { %4904 = vmatpush3.bf16.msra.mxu1 %v5631_v41  ;;  %4027 = vmatprep.subr.bf16.mxu0 %v5634_v42  ;;  %v5704_v41 = vld [vmem:[%s7626_s8 + $0x470] ss:$28 sps:$4 sm:$0xff]  }
 0x464   : > { %4905 = vmatprep.subr.bf16.mxu1 %v5635_v43  ;;  %v5709_v42 = vld [vmem:[%s7626_s8 + $0x4ac] ss:$28 sps:$4 sm:$0xff]  }
 0x465   : > { %v5707_v43 = vld [vmem:[%s7626_s8 + $0x4a8] ss:$28 sps:$4 sm:$0xff]  }
 0x466   : > { %4028 = vmatpush1.bf16.msra.mxu0 %v5632_v44  ;;  %v5712_v44 = vld [vmem:[%s7626_s8 + $0x4e4] ss:$28 sps:$4 sm:$0xff]  }
 0x467   : > { %4906 = vmatpush3.bf16.msra.mxu1 %v5636_v45  ;;  %4029 = vmatprep.subr.bf16.mxu0 %v5639_v46  ;;  %v5710_v45 = vld [vmem:[%s7626_s8 + $0x4e0] ss:$28 sps:$4 sm:$0xff]  }
 0x468   : > { %4907 = vmatprep.subr.bf16.mxu1 %v5640_v47  ;;  %v5715_v46 = vld [vmem:[%s7626_s8 + $0x51c] ss:$28 sps:$4 sm:$0xff]  }
 0x469   : > { %v5713_v47 = vld [vmem:[%s7626_s8 + $0x518] ss:$28 sps:$4 sm:$0xff]  }
 0x46a   : > { %4030 = vmatpush1.bf16.msra.mxu0 %v5637_v48  ;;  %v5718_v48 = vld [vmem:[%s7626_s8 + $0x554] ss:$28 sps:$4 sm:$0xff]  }
 0x46b   : > { %4908 = vmatpush3.bf16.msra.mxu1 %v5641_v49  ;;  %4031 = vmatprep.subr.bf16.mxu0 %v5644_v50  ;;  %v5716_v49 = vld [vmem:[%s7626_s8 + $0x550] ss:$28 sps:$4 sm:$0xff]  }
 0x46c   : > { %4909 = vmatprep.subr.bf16.mxu1 %v5645_v51  ;;  %v5721_v50 = vld [vmem:[%s7626_s8 + $0x58c] ss:$28 sps:$4 sm:$0xff]  }
 0x46d   : > { %v5719_v51 = vld [vmem:[%s7626_s8 + $0x588] ss:$28 sps:$4 sm:$0xff]  }
 0x46e   : > { %4032 = vmatpush1.bf16.msra.mxu0 %v5642_v52  ;;  %v5724_v52 = vld [vmem:[%s7626_s8 + $0x5c4] ss:$28 sps:$4 sm:$0xff]  }
 0x46f   : > { %4910 = vmatpush3.bf16.msra.mxu1 %v5646_v53  ;;  %4033 = vmatprep.subr.bf16.mxu0 %v5649_v54  ;;  %v5722_v53 = vld [vmem:[%s7626_s8 + $0x5c0] ss:$28 sps:$4 sm:$0xff]  }
 0x470   : > { %4911 = vmatprep.subr.bf16.mxu1 %v5650_v56  ;;  %v5727_v54 = vld [vmem:[%s7626_s8 + $0x5fc] ss:$28 sps:$4 sm:$0xff]  }
 0x471   : > { %v5725_v56 = vld [vmem:[%s7626_s8 + $0x5f8] ss:$28 sps:$4 sm:$0xff]  }
 0x472   : > { %4034 = vmatpush1.bf16.msra.mxu0 %v5647_v57  ;;  %v5730_v57 = vld [vmem:[%s7626_s8 + $0x634] ss:$28 sps:$4 sm:$0xff]  }
 0x473   : > { %4912 = vmatpush3.bf16.msra.mxu1 %v5651_v58  ;;  %4035 = vmatprep.subr.bf16.mxu0 %v5654_v59  ;;  %v5728_v58 = vld [vmem:[%s7626_s8 + $0x630] ss:$28 sps:$4 sm:$0xff]  }
 0x474   : > { %4919 = vmatprep.subr.bf16.mxu1 %v5655_v62  ;;  %v5733_v59 = vld [vmem:[%s7626_s8 + $0x66c] ss:$28 sps:$4 sm:$0xff]  }
 0x475   : > { %v5731_v62 = vld [vmem:[%s7626_s8 + $0x668] ss:$28 sps:$4 sm:$0xff]  }
 0x476   : > { %4134 = vmatmul.mubr.bf16.vlgmr.msra.gmra.mrb[16].mxu1 %v7048_v19  ;;  %4036 = vmatpush1.bf16.msra.mxu0 %v5652_v63  ;;  %v5736_v63 = vld [vmem:[%s7626_s8 + $0x6a4] ss:$28 sps:$4 sm:$0xff]  }
 0x477   : > { %4920 = vmatpush3.bf16.msra.mxu1 %v5656_v0  ;;  %4173 = vmatprep.mubr.bf16.mxu1 %v7058_v20  ;;  %v5734_v0 = vld [vmem:[%s7626_s8 + $0x6a0] ss:$28 sps:$4 sm:$0xff]  }
 0x478   : > { %4037 = vmatprep.subr.bf16.mxu0 %v5659_v1  ;;  %4921 = vmatprep.subr.bf16.mxu1 %v5660_v2  ;;  %v5739_v1 = vld [vmem:[%s7626_s8 + $0x6dc] ss:$28 sps:$4 sm:$0xff]  }
 0x479   : > { %v5737_v2 = vld [vmem:[%s7626_s8 + $0x6d8] ss:$28 sps:$4 sm:$0xff]  }
 0x47a   : > { %4038 = vmatpush1.bf16.msra.mxu0 %v5657_v8  ;;  %v7544_v8 = vld [vmem:[%s7627_s9] sm:$0x7f] }
 0x47b   : > { %4922 = vmatpush3.bf16.msra.mxu1 %v5661_v9  ;;  %4039 = vmatprep.subr.bf16.mxu0 %v5664_v10  ;;  %v2671_v9 = vrot.slane %v7544_v8, %v6653_v4  ;;  %v2679_v10 = vrot.slane %v7544_v8, %v6747_v61 }
 0x47c   : > { %4923 = vmatprep.subr.bf16.mxu1 %v5665_v11  ;;  %v2675_v11 = vrot.slane %v7544_v8, %v6661_v6 }
 0x47e   : > { %4040 = vmatpush1.bf16.msra.mxu0 %v5662_v14  ;;  %v2683_v14 = vrot.slane %v7544_v8, %v6664_v7 }
 0x47f   : > { %4924 = vmatpush3.bf16.msra.mxu1 %v5666_v15  ;;  %4041 = vmatprep.subr.bf16.mxu0 %v5669_v16 }
 0x480   : > { %4925 = vmatprep.subr.bf16.mxu1 %v5670_v5 }
 0x482   : > { %4042 = vmatpush1.bf16.msra.mxu0 %v5667_v18 }
 0x483   : > { %4926 = vmatpush3.bf16.msra.mxu1 %v5671_v13  ;;  %4043 = vmatprep.subr.bf16.mxu0 %v5674_v17 }
 0x484   : > { %4927 = vmatprep.subr.bf16.mxu1 %v5675_v55 }
 0x486   : > { %4044 = vmatpush1.bf16.msra.mxu0 %v5672_v21 }
 0x487   : > { %4928 = vmatpush3.bf16.msra.mxu1 %v5676_v22  ;;  %4045 = vmatprep.subr.bf16.mxu0 %v5679_v23 }
 0x488   : > { %4929 = vmatprep.subr.bf16.mxu1 %v5680_v24 }
 0x48a   : > { %4046 = vmatpush1.bf16.msra.mxu0 %v5677_v60 }
 0x48b   : > { %4930 = vmatpush3.bf16.msra.mxu1 %v5681_v25  ;;  %4047 = vmatprep.subr.bf16.mxu0 %v5684_v26 }
 0x48c   : > { %4931 = vmatprep.subr.bf16.mxu1 %v5685_v27 }
 0x48e   : > { %4048 = vmatpush1.bf16.msra.mxu0 %v5682_v28 }
 0x48f   : > { %4932 = vmatpush3.bf16.msra.mxu1 %v5686_v30  ;;  %4049 = vmatprep.subr.bf16.mxu0 %v5689_v31 }
 0x490   : > { %4933 = vmatprep.subr.bf16.mxu1 %v5690_v32 }
 0x492   : > { %4050 = vmatpush1.bf16.msra.mxu0 %v5687_v33 }
 0x493   : > { %4934 = vmatpush3.bf16.msra.mxu1 %v5691_v34  ;;  %4060 = vmatprep.subr.bf16.mxu0 %v5694_v35 }
 0x495   : > { %4052 = vmatmul.mubr.bf16.vlgmr.msra.gmra.mrb[12].mxu0 %v7048_v19  ;;  %v5703_v19 = vld [vmem:[%s7626_s8 + $0x43c] ss:$28 sps:$4 sm:$0xff]  }
 0x496   : > { %4174 = vmatmul.mubr.bf16.vlgmr.msra.gmra.mrb[20].mxu1 %v7250_v29  ;;  %4061 = vmatpush1.bf16.msra.mxu0 %v5692_v36 }
 0x497   : > { %4092 = vmatprep.mubr.bf16.mxu0 %v7058_v20  ;;  %4062 = vmatprep.subr.bf16.mxu0 %v5697_v37  ;;  %v5701_v20 = vld [vmem:[%s7626_s8 + $0x438] ss:$28 sps:$4 sm:$0xff]  }
 0x49a   : > { %4063 = vmatpush1.bf16.msra.mxu0 %v5695_v12 }
 0x49b   : > { %4064 = vmatprep.subr.bf16.mxu0 %v5700_v38 }
 0x49e   : > { %4065 = vmatpush1.bf16.msra.mxu0 %v5698_v39 }
 0x49f   : > { %4066 = vmatprep.subr.bf16.mxu0 %v5703_v19 }
 0x4a2   : > { %4067 = vmatpush1.bf16.msra.mxu0 %v5701_v20 }
 0x4a3   : > { %4068 = vmatprep.subr.bf16.mxu0 %v5706_v40 }
 0x4a6   : > { %4069 = vmatpush1.bf16.msra.mxu0 %v5704_v41  ;;  %v2694_v41 = vsub.s32 6, %v6650_v3 }
 0x4a7   : > { %4070 = vmatprep.subr.bf16.mxu0 %v5709_v42 }
 0x4a8   : > { %v2695_v42 = vrot.slane %v7544_v8, %v2694_v41 }
 0x4aa   : > { %4071 = vmatpush1.bf16.msra.mxu0 %v5707_v43 }
 0x4ab   : > { %4072 = vmatprep.subr.bf16.mxu0 %v5712_v44 }
 0x4ae   : > { %4073 = vmatpush1.bf16.msra.mxu0 %v5710_v45 }
 0x4af   : > { %4074 = vmatprep.subr.bf16.mxu0 %v5715_v46 }
 0x4b2   : > { %4075 = vmatpush1.bf16.msra.mxu0 %v5713_v47 }
 0x4b3   : > { %4076 = vmatprep.subr.bf16.mxu0 %v5718_v48 }
 0x4b6   : > { %4077 = vmatpush1.bf16.msra.mxu0 %v5716_v49 }
 0x4b7   : > { %4078 = vmatprep.subr.bf16.mxu0 %v5721_v50 }
 0x4ba   : > { %4079 = vmatpush1.bf16.msra.mxu0 %v5719_v51 }
 0x4bb   : > { %4080 = vmatprep.subr.bf16.mxu0 %v5724_v52 }
 0x4be   : > { %4081 = vmatpush1.bf16.msra.mxu0 %v5722_v53 }
 0x4bf   : > { %4082 = vmatprep.subr.bf16.mxu0 %v5727_v54 }
 0x4c2   : > { %4083 = vmatpush1.bf16.msra.mxu0 %v5725_v56  ;;  %v2686_v56 = vsub.s32 4, %v6650_v3 }
 0x4c3   : > { %4084 = vmatprep.subr.bf16.mxu0 %v5730_v57  ;;  %v2690_v57 = vsub.s32 5, %v6650_v3 }
 0x4c6   : > { %4085 = vmatpush1.bf16.msra.mxu0 %v5728_v58  ;;  %v2687_v58 = vrot.slane %v7544_v8, %v2686_v56 }
 0x4c7   : > { %4086 = vmatprep.subr.bf16.mxu0 %v5733_v59  ;;  %v2691_v59 = vrot.slane %v7544_v8, %v2690_v57 }
 0x4ca   : > { %4087 = vmatpush1.bf16.msra.mxu0 %v5731_v62 }
 0x4cb   : > { %4088 = vmatprep.subr.bf16.mxu0 %v5736_v63 }
 0x4ce   : > { %4089 = vmatpush1.bf16.msra.mxu0 %v5734_v0 }
 0x4cf   : > { %4090 = vmatprep.subr.bf16.mxu0 %v5739_v1 }
 0x4d2   : > { %4091 = vmatpush1.bf16.msra.mxu0 %v5737_v2 }
 0x4d5   : > { %4093 = vmatmul.mubr.bf16.vlgmr.msra.gmra.mrb[12].mxu0 %v7250_v29 }
 0x528   : > { %v3930_v15 = vpop.f32.mrb[8].mxu0  ;;  %v4012_v16 = vpop.f32.mrb[12].mxu1 }
 0x529   : > { %v5009_v29 = vadd.f32 %v3930_v15, %v2671_v9  ;;  %v5011_v5 = vadd.f32 %v4012_v16, %v2679_v10  ;;  %v3932_v18 = vpop.f32.mrb[9].mxu0  ;;  %v4014_v13 = vpop.f32.mrb[13].mxu1 }
 0x52a   : > { %v5010_v17 = vadd.f32 %v3932_v18, %v2675_v11  ;;  %v5012_v55 = vadd.f32 %v4014_v13, %v2683_v14  ;;  %v3934_v21 = vpop.f32.mrb[10].mxu0  ;;  %v4016_v4 = vpop.f32.mrb[14].mxu1 }
 0x52b   : > { %v4181_v22 = vmul.f32 0.5, %v5009_v29  ;;  %v4183_v61 = vmul.f32 0.5, %v5011_v5  ;;  %v3935_v23 = vpop.f32.mrb[11].mxu0  ;;  %v4017_v24 = vpop.f32.mrb[15].mxu1 }
 0x52c   : > { %v4182_v6 = vmul.f32 0.5, %v5010_v17  ;;  %v4184_v60 = vmul.f32 0.5, %v5012_v55 }
 0x52d   : > { %5742 = vtanh.f32 %v4181_v22 }
 0x52e   : > { %5744 = vtanh.f32 %v4183_v61 }
 0x52f   : > { %5746 = vtanh.f32 %v4182_v6 }
 0x530   : > { %5748 = vtanh.f32 %v4184_v60 }
 0x537   : > { %v5743_v7 = vpop.eup %5742 }
 0x538   : > { %v5745_v25 = vpop.eup %5744  ;;  %v4195_v26 = vadd.f32 1.0, %v5743_v7 }
 0x539   : > { %v5747_v27 = vpop.eup %5746  ;;  %v4197_v28 = vadd.f32 1.0, %v5745_v25 }
 0x53a   : > { %v5749_v30 = vpop.eup %5748  ;;  %v4202_v31 = vmul.f32 0.5, %v4195_v26  ;;  %v4196_v32 = vadd.f32 1.0, %v5747_v27 }
 0x53b   : > { %v4204_v33 = vmul.f32 0.5, %v4197_v28  ;;  %v4198_v34 = vadd.f32 1.0, %v5749_v30 }
 0x53c   : > { %v4203_v35 = vmul.f32 0.5, %v4196_v32 }
 0x53d   : > { %v4205_v36 = vmul.f32 0.5, %v4198_v34 }
 0x53e   : > { %v4823_v37 = vpack.c.bf16 %v4203_v35, %v4202_v31 }
 0x53f   : > { %v4824_v12 = vpack.c.bf16 %v4205_v36, %v4204_v33 }
 0x540   : > { %4238 = vst [vmem:[%s7557_s25] sm:$0xff] %v4823_v37 }
 0x541   : > { %4239 = vst [vmem:[%s7557_s25 + $0x8] sm:$0xff] %v4824_v12 }
 0x549   : > { %v4913_v38 = vpop.f32.mrb[16].mxu1 }
 0x54a   : > { %v4914_v39 = vpop.f32.mrb[17].mxu1 }
 0x54b   : > { %v4915_v19 = vadd.f32 %v4914_v39, %v4913_v38  ;;  %v4916_v20 = vpop.f32.mrb[18].mxu1 }
 0x54c   : > { %v4917_v40 = vpop.f32.mrb[19].mxu1 }
 0x54d   : > { %v4136_v45 = vadd.f32 %v4915_v19, %v2695_v42 }
 0x569   : > { %v4935_v43 = vpop.f32.mrb[20].mxu1 }
 0x56a   : > { %v4936_v44 = vpop.f32.mrb[21].mxu1 }
 0x56b   : > { %v4937_v46 = vadd.f32 %v4936_v44, %v4935_v43  ;;  %v4938_v47 = vpop.f32.mrb[22].mxu1 }
 0x56c   : > { %v4939_v48 = vpop.f32.mrb[23].mxu1 }
 0x56d   : > { %v4176_v49 = vadd.f32 %v4937_v46, %v4136_v45 }
 0x56f   : > { %v4187_v50 = vmul.f32 0.5, %v4176_v49 }
 0x571   : > { %5750 = vtanh.f32 %v4187_v50 }
 0x57b   : > { %v5751_v51 = vpop.eup %5750 }
 0x57c   : > { %v4201_v52 = vadd.f32 1.0, %v5751_v51 }
 0x57e   : > { %v4208_v53 = vmul.f32 0.5, %v4201_v52 }
 0x580   : > { %v4826_v54 = vpack.c.bf16 %v4208_v53, %v4208_v53 }
 0x582   : > { %4242 = vst.msk [vmem:[%s7557_s25 + $0x18] sm:$0xf] %vm4241_vm2, %v4826_v54 }
 0x5a8   : > { %v4094_v62 = vpop.f32.mrb[12].mxu0 }
 0x5a9   : > { %v5013_v63 = vadd.f32 %v4094_v62, %v2687_v58  ;;  %v4096_v0 = vpop.f32.mrb[13].mxu0 }
 0x5aa   : > { %v5014_v1 = vadd.f32 %v4096_v0, %v2691_v59  ;;  %v4098_v2 = vpop.f32.mrb[14].mxu0 }
 0x5ab   : > { %v4185_v9 = vmul.f32 0.5, %v5013_v63  ;;  %v4099_v10 = vpop.f32.mrb[15].mxu0 }
 0x5ac   : > { %v4186_v11 = vmul.f32 0.5, %v5014_v1 }
 0x5ad   : > { %5752 = vtanh.f32 %v4185_v9 }
 0x5ae   : > { %5754 = vtanh.f32 %v4186_v11 }
 0x5b7   : > { %v5753_v3 = vpop.eup %5752 }
 0x5b8   : > { %v5755_v14 = vpop.eup %5754  ;;  %v4199_v15 = vadd.f32 1.0, %v5753_v3 }
 0x5b9   : > { %v4200_v16 = vadd.f32 1.0, %v5755_v14 }
 0x5ba   : > { %v4206_v8 = vmul.f32 0.5, %v4199_v15 }
 0x5bb   : > { %v4207_v29 = vmul.f32 0.5, %v4200_v16 }
 0x5bd   : > { %v4825_v5 = vpack.c.bf16 %v4207_v29, %v4206_v8 }
 0x5bf   : > { %4240 = vst [vmem:[%s7557_s25 + $0x10] sm:$0xff] %v4825_v5 }
 0x5c0   : > { %5769 = shalt.err (!%p5766_p3)
}
 0x5c1   : > { %s5770_s19 = scalar_lea.hbm %s7573_s30, 448  ;;  %s5774_s12 = scalar_lea.hbm %s7628_s10, 896 }
 0x5c2   : > { %p5771_p4 = scmp.ne.s32.totalorder %s7573_s30, %s5770_s19  ;;  %p5775_p9 = scmp.lt.u32.totalorder %s7573_s30, %s7628_s10 }
 0x5c3   : > { %p5776_p10 = scmp.lt.u32.totalorder %s5774_s12, %s5770_s19  ;;  %p5778_p12 = scmp.lt.u32.totalorder %s5770_s19, %s7573_s30 }
 0x5c4   : > { %p5772_p7 = pnand %p5771_p4, %p5921_p5 }
 0x5c5   : > { %p5777_p11 = por %p5776_p10, %p5775_p9 }
 0x5c6   : > { %p5773_p8 = pneg %p5772_p7 }
 0x5c7   : > { %p5779_p13 = por %p5778_p12, %p5777_p11 }
 0x5c9   : > { %p5780_p0 = pnand %p5779_p13, %p5773_p8 }
 0x5cb   : > { %5783 = shalt.err (!%p5780_p0)
}
 0x5cc   : > { %5054 = dma.vmem_to_hbm [thread:$0]  (%p5921_p5), %s7575_s24, 448, %s7573_s30, %s4245_s26  }
 0x5cd PF: > { %p5060_p1 = scmp.ge.s32.totalorder %s5818_s20, 2  ;;  %s4278_s29 = sand.u32 1, %s5806_s17  }
 0x5ce   : > { %s4279_s0 = scalar_lea.sflag [#allocation3], %s4278_s29 }
 0x5cf   : > { %p5057_p2 = pnand %p5060_p1, %p5925_p6 }
 0x5d1   : > { %5801 = dma.done.wait (!%p5057_p2), %s4279_s0, 448  }
 0x5d2   : > { %5803 = vsyncadd (!%p5057_p2), %s4279_s0, 4294966848  ;;  %s7640_s20 = sld [smem:[#allocation6_spill]]  ;;  %s7641_s13 = sld [smem:[#allocation5_spill]] }
 0x5d3   : > { %s7642_s19 = sld [smem:[#allocation7_spill]]  ;;  %s7643_s17 = smov %s5810_s18 }
 0x5d8   : > { %p22_p3 = scmp.ge.s32.totalorder %s7640_s20, 4   ;;  %s7644_s18 = smov %s7641_s13 }
 0x5da   :  { %24 = sbr.rel (!%p22_p3) target bundleno = 5 (0x5), region = 110 }
 0x5e1   :  { %4291 = vsyncpa [#allocation3], 1 }
 0x5e2   :  { %4293 = vsyncpa [#allocation3 + $0x1], 1 }

</bundles_post_ra>
